<compile_context>
chip_gen: v7x
topology: tpu7x:2x2x1
jax: 0.10.0
libtpu: 0.0.40
codegen_flags: <defaults>
</compile_context>

<pallas_src>
import jax
import jax.numpy as jnp
from jax import lax
from jax.experimental import pallas as pl
from jax.experimental.pallas import tpu as pltpu


def _round_up(n, m):
    return ((n + m - 1) // m) * m


def _crf_block_kernel(x_ref, w_ref, b_ref, trans3_ref, transf_ref,
                      start_ref, end_ref, mask_ref, labels_ref,
                      out_ref, logit_scr):
    """One batch block: per-example negative CRF log-likelihood -> (1, 1, TB)."""
    S, TB, D = x_ref.shape
    L = w_ref.shape[1]
    LL = transf_ref.shape[0]

    # ---- classifier: single MXU matmul with M = S*TB rows ----
    x2 = x_ref[...].reshape(S * TB, D)
    logits2 = jnp.dot(x2, w_ref[...], preferred_element_type=jnp.float32) + b_ref[...]
    # time-major, labels on sublanes, batch on lanes: one transpose, written once
    logits_slt = jnp.transpose(logits2.reshape(S, TB, L), (0, 2, 1))     # (S, L, TB)
    logit_scr[...] = logits_slt

    mask_t = mask_ref[...]                     # (S, TB) f32 (already time-major)
    labels_t = labels_ref[...]                 # (S, TB) i32 (already time-major)

    # ---- numerator (joint score), fully vectorized in (S, L, TB) layout ----
    lab_iota = lax.broadcasted_iota(jnp.int32, (S, L, TB), 1)
    onehot = (lab_iota == labels_t[:, None, :]).astype(jnp.float32)      # (S, L, TB)

    # emission: sum_i logits[i, tag_i] * mask[i]   (covers the "last emission" term too)
    emit = jnp.sum(logits_slt * onehot, axis=1) * mask_t                 # (S, TB)
    emit_score = jnp.sum(emit, axis=0, keepdims=True)                    # (1, TB)

    # transitions: sum_i trans[tag_i, tag_{i+1}] * mask[i+1]  (VPU one-hot select,
    # no tiny K=N=L matmul)
    if S > 1:
        flat_idx = labels_t[:-1] * L + labels_t[1:]                      # (S-1, TB)
        ll_iota = lax.broadcasted_iota(jnp.int32, (S - 1, LL, TB), 1)
        pair_oh = (ll_iota == flat_idx[:, None, :]).astype(jnp.float32)  # (S-1, LL, TB)
        pair = jnp.sum(pair_oh * transf_ref[...][None, :, :], axis=1)    # (S-1, TB)
        trans_score = jnp.sum(pair * mask_t[1:], axis=0, keepdims=True)
    else:
        trans_score = jnp.zeros((1, TB), jnp.float32)

    # start transition for tag_0
    lt_iota = lax.broadcasted_iota(jnp.int32, (L, TB), 0)
    start_oh = (lt_iota == labels_t[0:1, :]).astype(jnp.float32)         # (L, TB)
    start_score = jnp.sum(start_oh * start_ref[...], axis=0, keepdims=True)

    # end transition for the tag at the last unmasked position
    seq_len = jnp.sum(mask_t, axis=0, keepdims=True)                     # (1, TB)
    last_idx = seq_len.astype(jnp.int32) - 1
    seq_iota = lax.broadcasted_iota(jnp.int32, (S, TB), 0)
    last_tag = jnp.sum(jnp.where(seq_iota == last_idx, labels_t, 0),
                       axis=0, keepdims=True)                            # (1, TB) i32
    end_oh = (lt_iota == last_tag).astype(jnp.float32)                   # (L, TB)
    end_score = jnp.sum(end_oh * end_ref[...], axis=0, keepdims=True)

    score = start_score + emit_score + trans_score + end_score           # (1, TB)

    # ---- log-partition: forward recursion, batch on the lane axis ----
    # Transition cube broadcast hoisted out of the loop (JAX does not CSE it).
    # NOTE: keep L*L*TB*4 bytes small (<= ~128 KiB); chunk Lprev for large label sets.
    trans_bc = jnp.broadcast_to(trans3_ref[...], (L, L, TB))             # (Lprev, Lnext, TB)
    alpha0 = logit_scr[0] + start_ref[...]                               # (L, TB)

    def body(i, alpha):
        inner = alpha[:, None, :] + trans_bc                             # (Lprev, Lnext, TB)
        m = jnp.max(inner, axis=0)                                       # (L, TB)
        lse = jnp.log(jnp.sum(jnp.exp(inner - m[None, :, :]), axis=0)) + m
        new_alpha = lse + logit_scr[i]                                   # emission added post-LSE
        mi = mask_ref[pl.ds(i, 1), :]                                    # (1, TB)
        return new_alpha * mi + alpha * (1.0 - mi)

    alpha = lax.fori_loop(1, S, body, alpha0,
                          unroll=(True if S <= 32 else 8))

    stops = alpha + end_ref[...]                                         # (L, TB)
    ms = jnp.max(stops, axis=0, keepdims=True)
    denom = jnp.log(jnp.sum(jnp.exp(stops - ms), axis=0, keepdims=True)) + ms

    # zero out batch-padding rows (and degenerate all-masked rows)
    valid = (seq_len > 0.0).astype(jnp.float32)                          # (1, TB)
    nll = -(score - denom) * valid                                       # (1, TB)
    out_ref[...] = nll.reshape(1, 1, TB)


def crf_output_layer_loss(x, mask, labels, params, *, block_b=128):
    """loss = -sum_b CRF log-likelihood.  Pallas kernel with a batch-block grid."""
    B, S, D = x.shape
    L = params["w"].shape[0]
    itemsize = jnp.dtype(x.dtype).itemsize

    # Batch tile: the batch is the lane axis of the recursion / output, so favor
    # full 128-lane tiles; sub-128 only when the whole (padded) batch is one block.
    sub = 16 if itemsize == 2 else 8                     # bf16 sublane packing
    if B <= max(block_b, 8):
        TB = _round_up(max(B, 1), sub)                   # single block: TB == padded batch
    else:
        TB = _round_up(block_b, 128)                     # multi-block: lane-aligned tiles
    G = -(-B // TB)
    Bp = G * TB
    pad = Bp - B

    # ---- layout plumbing in plain JAX (outside the kernel) ----
    x_p = jnp.pad(x, ((0, pad), (0, 0), (0, 0))) if pad else x
    x_t = jnp.transpose(x_p, (1, 0, 2))                  # (S, Bp, D), native dtype
    mask_f = mask.astype(jnp.float32)
    labels_i = labels.astype(jnp.int32)
    if pad:
        mask_f = jnp.pad(mask_f, ((0, pad), (0, 0)))
        labels_i = jnp.pad(labels_i, ((0, pad), (0, 0)))
    mask_t = mask_f.T                                    # (S, Bp) time-major
    labels_t = labels_i.T                                # (S, Bp) time-major

    w_t = params["w"].T.astype(x.dtype)                  # (D, L); bf16 x keeps bf16 DMA
    bias = params["b"].reshape(1, L).astype(jnp.float32)
    trans = params["trans"].astype(jnp.float32)
    trans3 = trans.reshape(L, L, 1)                      # (Lprev, Lnext, 1): recursion
    trans_flat = trans.reshape(L * L, 1)                 # row-major (p*L + n, 1): numerator
    start_c = params["start"].reshape(L, 1).astype(jnp.float32)
    end_c = params["end"].reshape(L, 1).astype(jnp.float32)

    # ---- VMEM budget, clamped to the chip's capacity (64 MiB/TC on v7x) ----
    l_sub = _round_up(L, 8)
    ll_sub = _round_up(L * L, 8)
    lane_l = 128
    vmem_bytes = int(
        2 * S * TB * D * itemsize                        # x tile, double-buffered
        + 2 * 2 * S * TB * 4                             # mask + labels tiles
        + 2 * (D + 16) * lane_l * 4                      # resident params (lane padded)
        + S * l_sub * TB * 4                             # logits scratch (S, L, TB)
        + S * TB * lane_l * 4                            # matmul output / transpose temp
        + (2 * S * l_sub + S * ll_sub + 6 * l_sub) * TB * 4   # one-hots + recursion temps
        + (8 << 20))                                     # slack
    try:
        cap = int(pltpu.get_tpu_info().vmem_capacity_bytes)
    except Exception:
        cap = 64 << 20                                   # conservative (v7x per-TC VMEM)
    vmem_limit = int(max(32 << 20, min(vmem_bytes, cap - (4 << 20))))

    cost = pl.CostEstimate(
        flops=int(2 * Bp * S * D * L + 12 * Bp * S * L * L),
        transcendentals=int(Bp * S * L * (L + 1)),
        bytes_accessed=int(x_t.size * itemsize + 2 * Bp * S * 4
                           + (D * L + 2 * L * L + 3 * L) * 4 + Bp * 4),
    )

    grid_spec = pltpu.PrefetchScalarGridSpec(
        num_scalar_prefetch=0,
        grid=(G,),
        in_specs=[
            pl.BlockSpec((S, TB, D), lambda i: (0, i, 0)),     # x block (time-major)
            pl.BlockSpec((D, L), lambda i: (0, 0)),            # W^T
            pl.BlockSpec((1, L), lambda i: (0, 0)),            # bias
            pl.BlockSpec((L, L, 1), lambda i: (0, 0, 0)),      # transitions (recursion)
            pl.BlockSpec((L * L, 1), lambda i: (0, 0)),        # transitions, flat (numerator)
            pl.BlockSpec((L, 1), lambda i: (0, 0)),            # start (column)
            pl.BlockSpec((L, 1), lambda i: (0, 0)),            # end (column)
            pl.BlockSpec((S, TB), lambda i: (0, i)),           # mask block, time-major
            pl.BlockSpec((S, TB), lambda i: (0, i)),           # labels block, time-major
        ],
        out_specs=pl.BlockSpec((1, 1, TB), lambda i: (i, 0, 0)),   # lane-dense NLL tile
        scratch_shapes=[
            pltpu.VMEM((S, L, TB), jnp.float32),               # logits, (S, L, TB)
        ],
    )

    nll = pl.pallas_call(
        _crf_block_kernel,
        out_shape=jax.ShapeDtypeStruct((G, 1, TB), jnp.float32),
        grid_spec=grid_spec,
        compiler_params=pltpu.CompilerParams(
            dimension_semantics=("parallel",),                 # batch blocks -> 2 TCs on v7x
            vmem_limit_bytes=vmem_limit),
        cost_estimate=cost,
    )(x_t, w_t, bias, trans3, trans_flat, start_c, end_c, mask_t, labels_t)

    return jnp.sum(nll)   # padded batch rows contribute exactly 0


class CRFPerTaskOutputLayer:
    """Per-task (Linear + CRF) output layer; one parameter set per task."""

    def __init__(self, in_dim, tasks, key):
        self.per_task_params = {}
        for i, (task_name, task_labels) in enumerate(tasks):
            num_labels = len(task_labels)
            k = jax.random.fold_in(key, i)
            k1, k2, k3, k4, k5 = jax.random.split(k, 5)
            bound = 1.0 / (in_dim ** 0.5)
            self.per_task_params[task_name] = {
                # torch.nn.Linear default init (uniform +/- 1/sqrt(in_dim))
                "w": jax.random.uniform(k1, (num_labels, in_dim), jnp.float32,
                                        -bound, bound),
                "b": jax.random.uniform(k2, (num_labels,), jnp.float32,
                                        -bound, bound),
                # CRF params: xavier_normal transitions, normal start/end
                "trans": jax.random.normal(k3, (num_labels, num_labels),
                                           jnp.float32)
                         * (2.0 / (2 * num_labels)) ** 0.5,
                "start": jax.random.normal(k4, (num_labels,), jnp.float32),
                "end": jax.random.normal(k5, (num_labels,), jnp.float32),
            }

    def __call__(self, task, x, mask, labels=None, output_all_tasks=False):
        params = self.per_task_params[task]
        outputs = {}
        if labels is not None:
            # training branch: loss = -CRF log-likelihood
            outputs["loss"] = crf_output_layer_loss(x, mask, labels, params)
        else:
            # TODO(synk): crf.viterbi_tags (inference decode with backpointers) has no clean Pallas port here.
            raise NotImplementedError("viterbi decoding path not implemented")
        if output_all_tasks:
            # TODO(synk): output_all_tasks requires the viterbi (labels is None) path.
            raise NotImplementedError("output_all_tasks not implemented")
        return outputs


if __name__ == "__main__":
    key = jax.random.PRNGKey(0)
    B, S, D = 2, 8, 32
    tasks = [
        ("task_a", ["O", "B", "I", "E", "S"]),          # 5 labels
        ("task_b", ["l%d" % i for i in range(7)]),      # 7 labels
    ]
    layer = CRFPerTaskOutputLayer(D, tasks, jax.random.fold_in(key, 1000))

    kx, kla, klb = jax.random.split(key, 3)
    x = jax.random.normal(kx, (B, S, D), jnp.float32)
    lengths = jnp.array([S, 5], dtype=jnp.int32)
    mask = (jnp.arange(S)[None, :] < lengths[:, None]).astype(jnp.float32)

    labels_a = jax.random.randint(kla, (B, S), 0, 5).astype(jnp.int32)
    out_a = layer("task_a", x, mask, labels_a)
    loss_a = jax.block_until_ready(out_a["loss"])

    labels_b = jax.random.randint(klb, (B, S), 0, 7).astype(jnp.int32)
    out_b = layer("task_b", x, mask, labels_b)
    loss_b = jax.block_until_ready(out_b["loss"])

    # exercise the single-block path with batch padding (B=10 -> TB=16)
    B2 = 10
    kx2, kl2 = jax.random.split(jax.random.fold_in(key, 7))
    x2 = jax.random.normal(kx2, (B2, S, D), jnp.float32)
    lengths2 = jnp.array([S, 5, 3, S, 1, 7, 2, S, 4, 6], dtype=jnp.int32)
    mask2 = (jnp.arange(S)[None, :] < lengths2[:, None]).astype(jnp.float32)
    labels2 = jax.random.randint(kl2, (B2, S), 0, 5).astype(jnp.int32)
    out_c = layer("task_a", x2, mask2, labels2)
    loss_c = jax.block_until_ready(out_c["loss"])

    # exercise the multi-block grid (G > 1, TB = 128) + padding path
    B3 = 150
    kx3, kl3 = jax.random.split(jax.random.fold_in(key, 99))
    x3 = jax.random.normal(kx3, (B3, S, D), jnp.float32)
    lengths3 = jax.random.randint(jax.random.fold_in(key, 5), (B3,), 1, S + 1)
    mask3 = (jnp.arange(S)[None, :] < lengths3[:, None]).astype(jnp.float32)
    labels3 = jax.random.randint(kl3, (B3, S), 0, 5).astype(jnp.int32)
    out_d = layer("task_a", x3, mask3, labels3)
    loss_d = jax.block_until_ready(out_d["loss"])

    ok = (jnp.isfinite(loss_a) and jnp.isfinite(loss_b)
          and jnp.isfinite(loss_c) and jnp.isfinite(loss_d))
    assert ok
    print("KERNEL_OK")
</pallas_src>

<mosaic_0001>
module attributes {stable_mosaic.version = 11 : i64} {
  func.func @_crf_block_kernel(%arg0: i32, %arg1: memref<8x8x32xf32, #tpu.memory_space<vmem>>, %arg2: memref<32x5xf32, #tpu.memory_space<vmem>>, %arg3: memref<1x5xf32, #tpu.memory_space<vmem>>, %arg4: memref<5x5x1xf32, #tpu.memory_space<vmem>>, %arg5: memref<25x1xf32, #tpu.memory_space<vmem>>, %arg6: memref<5x1xf32, #tpu.memory_space<vmem>>, %arg7: memref<5x1xf32, #tpu.memory_space<vmem>>, %arg8: memref<8x8xf32, #tpu.memory_space<vmem>>, %arg9: memref<8x8xi32, #tpu.memory_space<vmem>>, %arg10: memref<1x1x8xf32, #tpu.memory_space<vmem>>, %arg11: memref<8x5x8xf32, #tpu.memory_space<vmem>>) attributes {dimension_semantics = [#tpu.dimension_semantics<parallel>], iteration_bounds = array<i64: 1>, scalar_prefetch = 0 : i64, scratch_operands = 1 : i64, tpu.core_type = #tpu.core_type<tc>, window_params = [{transform_indices = @transform_0, window_bounds = array<i64: 8, 8, 32>}, {pipeline_mode = #tpu.pipeline_mode<synchronous>, transform_indices = @transform_1, window_bounds = array<i64: 32, 5>}, {pipeline_mode = #tpu.pipeline_mode<synchronous>, transform_indices = @transform_2, window_bounds = array<i64: 1, 5>}, {pipeline_mode = #tpu.pipeline_mode<synchronous>, transform_indices = @transform_3, window_bounds = array<i64: 5, 5, 1>}, {pipeline_mode = #tpu.pipeline_mode<synchronous>, transform_indices = @transform_4, window_bounds = array<i64: 25, 1>}, {pipeline_mode = #tpu.pipeline_mode<synchronous>, transform_indices = @transform_5, window_bounds = array<i64: 5, 1>}, {pipeline_mode = #tpu.pipeline_mode<synchronous>, transform_indices = @transform_6, window_bounds = array<i64: 5, 1>}, {transform_indices = @transform_7, window_bounds = array<i64: 8, 8>}, {transform_indices = @transform_8, window_bounds = array<i64: 8, 8>}, {transform_indices = @transform_9, window_bounds = array<i64: 1, 1, 8>}]} {
    %c0 = arith.constant 0 : index
    %c0_0 = arith.constant 0 : index
    %c0_1 = arith.constant 0 : index
    %0 = vector.load %arg1[%c0, %c0_0, %c0_1] : memref<8x8x32xf32, #tpu.memory_space<vmem>>, vector<8x8x32xf32>
    %1 = vector.shape_cast %0 : vector<8x8x32xf32> to vector<64x32xf32>
    %c0_2 = arith.constant 0 : index
    %c0_3 = arith.constant 0 : index
    %2 = vector.load %arg2[%c0_2, %c0_3] : memref<32x5xf32, #tpu.memory_space<vmem>>, vector<32x5xf32>
    %cst = arith.constant dense<0.000000e+00> : vector<64x5xf32>
    %3 = tpu.matmul %1, %2, %cst {dimension_numbers = #tpu.dot_dimension_numbers<[1], [0], [0], [1], [0, 0, 1, 1], [], []>} : vector<64x32xf32>, vector<32x5xf32>, vector<64x5xf32> -> vector<64x5xf32>
    %c0_4 = arith.constant 0 : index
    %c0_5 = arith.constant 0 : index
    %4 = vector.load %arg3[%c0_4, %c0_5] : memref<1x5xf32, #tpu.memory_space<vmem>>, vector<1x5xf32>
    %5 = vector.broadcast %4 : vector<1x5xf32> to vector<64x5xf32>
    %6 = arith.addf %3, %5 : vector<64x5xf32>
    %7 = vector.shape_cast %6 : vector<64x5xf32> to vector<8x8x5xf32>
    %8 = tpu.transpose %7, [0, 2, 1] : vector<8x8x5xf32> -> vector<8x5x8xf32>
    %c0_6 = arith.constant 0 : index
    %c0_7 = arith.constant 0 : index
    %c0_8 = arith.constant 0 : index
    %9 = vector.load %arg11[%c0_6, %c0_7, %c0_8] : memref<8x5x8xf32, #tpu.memory_space<vmem>>, vector<8x5x8xf32>
    tpu.vector_store %arg11[%c0_6, %c0_7, %c0_8], %8 {strides = array<i32>} : memref<8x5x8xf32, #tpu.memory_space<vmem>>, vector<8x5x8xf32>,
    %c0_9 = arith.constant 0 : index
    %c0_10 = arith.constant 0 : index
    %10 = vector.load %arg8[%c0_9, %c0_10] : memref<8x8xf32, #tpu.memory_space<vmem>>, vector<8x8xf32>
    %c0_11 = arith.constant 0 : index
    %c0_12 = arith.constant 0 : index
    %11 = vector.load %arg9[%c0_11, %c0_12] : memref<8x8xi32, #tpu.memory_space<vmem>>, vector<8x8xi32>
    %12 = tpu.iota {dimensions = array<i32: 1>} : vector<8x5x8xi32>
    %13 = vector.shape_cast %11 : vector<8x8xi32> to vector<8x1x8xi32>
    %14 = vector.broadcast %13 : vector<8x1x8xi32> to vector<8x5x8xi32>
    %15 = arith.cmpi eq, %12, %14 : vector<8x5x8xi32>
    %16 = arith.extui %15 : vector<8x5x8xi1> to vector<8x5x8xi32>
    %17 = arith.sitofp %16 : vector<8x5x8xi32> to vector<8x5x8xf32>
    %18 = arith.mulf %8, %17 : vector<8x5x8xf32>
    %cst_13 = arith.constant dense<0.000000e+00> : vector<8x8xf32>
    %19 = vector.multi_reduction <add>, %18, %cst_13 [1] : vector<8x5x8xf32> to vector<8x8xf32>
    %20 = arith.mulf %19, %10 : vector<8x8xf32>
    %cst_14 = arith.constant dense<0.000000e+00> : vector<8xf32>
    %21 = vector.multi_reduction <add>, %20, %cst_14 [0] : vector<8x8xf32> to vector<8xf32>
    %22 = vector.shape_cast %21 : vector<8xf32> to vector<1x8xf32>
    %23 = vector.extract_strided_slice %11 {offsets = [0, 0], sizes = [7, 8], strides = [1, 1]} : vector<8x8xi32> to vector<7x8xi32>
    %c5_i32 = arith.constant 5 : i32
    %24 = vector.broadcast %c5_i32 : i32 to vector<7x8xi32>
    %25 = arith.muli %23, %24 : vector<7x8xi32>
    %26 = vector.extract_strided_slice %11 {offsets = [1, 0], sizes = [7, 8], strides = [1, 1]} : vector<8x8xi32> to vector<7x8xi32>
    %27 = arith.addi %25, %26 : vector<7x8xi32>
    %28 = tpu.iota {dimensions = array<i32: 1>} : vector<7x25x8xi32>
    %29 = vector.shape_cast %27 : vector<7x8xi32> to vector<7x1x8xi32>
    %30 = vector.broadcast %29 : vector<7x1x8xi32> to vector<7x25x8xi32>
    %31 = arith.cmpi eq, %28, %30 : vector<7x25x8xi32>
    %32 = arith.extui %31 : vector<7x25x8xi1> to vector<7x25x8xi32>
    %33 = arith.sitofp %32 : vector<7x25x8xi32> to vector<7x25x8xf32>
    %c0_15 = arith.constant 0 : index
    %c0_16 = arith.constant 0 : index
    %34 = vector.load %arg5[%c0_15, %c0_16] : memref<25x1xf32, #tpu.memory_space<vmem>>, vector<25x1xf32>
    %35 = vector.shape_cast %34 : vector<25x1xf32> to vector<1x25x1xf32>
    %36 = vector.broadcast %35 : vector<1x25x1xf32> to vector<7x25x8xf32>
    %37 = arith.mulf %33, %36 : vector<7x25x8xf32>
    %cst_17 = arith.constant dense<0.000000e+00> : vector<7x8xf32>
    %38 = vector.multi_reduction <add>, %37, %cst_17 [1] : vector<7x25x8xf32> to vector<7x8xf32>
    %39 = vector.extract_strided_slice %10 {offsets = [1, 0], sizes = [7, 8], strides = [1, 1]} : vector<8x8xf32> to vector<7x8xf32>
    %40 = arith.mulf %38, %39 : vector<7x8xf32>
    %cst_18 = arith.constant dense<0.000000e+00> : vector<8xf32>
    %41 = vector.multi_reduction <add>, %40, %cst_18 [0] : vector<7x8xf32> to vector<8xf32>
    %42 = vector.shape_cast %41 : vector<8xf32> to vector<1x8xf32>
    %43 = tpu.iota {dimensions = array<i32: 0>} : vector<5x8xi32>
    %44 = vector.extract_strided_slice %11 {offsets = [0, 0], sizes = [1, 8], strides = [1, 1]} : vector<8x8xi32> to vector<1x8xi32>
    %45 = vector.broadcast %44 : vector<1x8xi32> to vector<5x8xi32>
    %46 = arith.cmpi eq, %43, %45 : vector<5x8xi32>
    %47 = arith.extui %46 : vector<5x8xi1> to vector<5x8xi32>
    %48 = arith.sitofp %47 : vector<5x8xi32> to vector<5x8xf32>
    %c0_19 = arith.constant 0 : index
    %c0_20 = arith.constant 0 : index
    %49 = vector.load %arg6[%c0_19, %c0_20] : memref<5x1xf32, #tpu.memory_space<vmem>>, vector<5x1xf32>
    %50 = vector.broadcast %49 : vector<5x1xf32> to vector<5x8xf32>
    %51 = arith.mulf %48, %50 : vector<5x8xf32>
    %cst_21 = arith.constant dense<0.000000e+00> : vector<8xf32>
    %52 = vector.multi_reduction <add>, %51, %cst_21 [0] : vector<5x8xf32> to vector<8xf32>
    %53 = vector.shape_cast %52 : vector<8xf32> to vector<1x8xf32>
    %cst_22 = arith.constant dense<0.000000e+00> : vector<8xf32>
    %54 = vector.multi_reduction <add>, %10, %cst_22 [0] : vector<8x8xf32> to vector<8xf32>
    %55 = vector.shape_cast %54 : vector<8xf32> to vector<1x8xf32>
    %56 = arith.fptosi %55 : vector<1x8xf32> to vector<1x8xi32>
    %c1_i32 = arith.constant 1 : i32
    %57 = vector.broadcast %c1_i32 : i32 to vector<1x8xi32>
    %58 = arith.subi %56, %57 : vector<1x8xi32>
    %59 = tpu.iota {dimensions = array<i32: 0>} : vector<8x8xi32>
    %60 = vector.broadcast %58 : vector<1x8xi32> to vector<8x8xi32>
    %61 = arith.cmpi eq, %59, %60 : vector<8x8xi32>
    %c0_i32 = arith.constant 0 : i32
    %62 = vector.broadcast %c0_i32 : i32 to vector<8x8xi32>
    %63 = arith.select %61, %11, %62 : vector<8x8xi1>, vector<8x8xi32>
    %cst_23 = arith.constant dense<0> : vector<8xi32>
    %64 = vector.multi_reduction <add>, %63, %cst_23 [0] : vector<8x8xi32> to vector<8xi32>
    %65 = vector.shape_cast %64 : vector<8xi32> to vector<1x8xi32>
    %66 = vector.broadcast %65 : vector<1x8xi32> to vector<5x8xi32>
    %67 = arith.cmpi eq, %43, %66 : vector<5x8xi32>
    %68 = arith.extui %67 : vector<5x8xi1> to vector<5x8xi32>
    %69 = arith.sitofp %68 : vector<5x8xi32> to vector<5x8xf32>
    %c0_24 = arith.constant 0 : index
    %c0_25 = arith.constant 0 : index
    %70 = vector.load %arg7[%c0_24, %c0_25] : memref<5x1xf32, #tpu.memory_space<vmem>>, vector<5x1xf32>
    %71 = vector.broadcast %70 : vector<5x1xf32> to vector<5x8xf32>
    %72 = arith.mulf %69, %71 : vector<5x8xf32>
    %cst_26 = arith.constant dense<0.000000e+00> : vector<8xf32>
    %73 = vector.multi_reduction <add>, %72, %cst_26 [0] : vector<5x8xf32> to vector<8xf32>
    %74 = vector.shape_cast %73 : vector<8xf32> to vector<1x8xf32>
    %75 = arith.addf %53, %22 : vector<1x8xf32>
    %76 = arith.addf %75, %42 : vector<1x8xf32>
    %77 = arith.addf %76, %74 : vector<1x8xf32>
    %c0_27 = arith.constant 0 : index
    %c0_28 = arith.constant 0 : index
    %c0_29 = arith.constant 0 : index
    %78 = vector.load %arg4[%c0_27, %c0_28, %c0_29] : memref<5x5x1xf32, #tpu.memory_space<vmem>>, vector<5x5x1xf32>
    %79 = vector.shape_cast %78 : vector<5x5x1xf32> to vector<5x5x1xf32>
    %80 = vector.broadcast %79 : vector<5x5x1xf32> to vector<5x5x8xf32>
    %c0_30 = arith.constant 0 : index
    %c0_31 = arith.constant 0 : index
    %c0_32 = arith.constant 0 : index
    %81 = vector.load %arg11[%c0_30, %c0_31, %c0_32] : memref<8x5x8xf32, #tpu.memory_space<vmem>>, vector<1x5x8xf32>
    %82 = vector.shape_cast %81 : vector<1x5x8xf32> to vector<5x8xf32>
    %c0_33 = arith.constant 0 : index
    %c0_34 = arith.constant 0 : index
    %83 = vector.load %arg6[%c0_33, %c0_34] : memref<5x1xf32, #tpu.memory_space<vmem>>, vector<5x1xf32>
    %84 = vector.broadcast %83 : vector<5x1xf32> to vector<5x8xf32>
    %85 = arith.addf %82, %84 : vector<5x8xf32>
    %c1_i32_35 = arith.constant 1 : i32
    %86 = vector.shape_cast %85 : vector<5x8xf32> to vector<5x1x8xf32>
    %87 = vector.broadcast %86 : vector<5x1x8xf32> to vector<5x5x8xf32>
    %88 = arith.addf %87, %80 : vector<5x5x8xf32>
    %cst_36 = arith.constant dense<0xFF800000> : vector<5x8xf32>
    %89 = vector.multi_reduction <maximumf>, %88, %cst_36 [0] : vector<5x5x8xf32> to vector<5x8xf32>
    %90 = vector.shape_cast %89 : vector<5x8xf32> to vector<1x5x8xf32>
    %91 = vector.broadcast %90 : vector<1x5x8xf32> to vector<5x5x8xf32>
    %92 = arith.subf %88, %91 : vector<5x5x8xf32>
    %93 = math.exp %92 : vector<5x5x8xf32>
    %cst_37 = arith.constant dense<0.000000e+00> : vector<5x8xf32>
    %94 = vector.multi_reduction <add>, %93, %cst_37 [0] : vector<5x5x8xf32> to vector<5x8xf32>
    %95 = math.log %94 : vector<5x8xf32>
    %96 = arith.addf %95, %89 : vector<5x8xf32>
    %97 = arith.index_cast %c1_i32_35 : i32 to index
    %c0_38 = arith.constant 0 : index
    %c0_39 = arith.constant 0 : index
    %98 = vector.load %arg11[%97, %c0_38, %c0_39] : memref<8x5x8xf32, #tpu.memory_space<vmem>>, vector<1x5x8xf32>
    %99 = vector.shape_cast %98 : vector<1x5x8xf32> to vector<5x8xf32>
    %100 = arith.addf %96, %99 : vector<5x8xf32>
    %101 = arith.index_cast %c1_i32_35 : i32 to index
    %c0_40 = arith.constant 0 : index
    %102 = vector.load %arg8[%101, %c0_40] : memref<8x8xf32, #tpu.memory_space<vmem>>, vector<1x8xf32>
    %103 = vector.broadcast %102 : vector<1x8xf32> to vector<5x8xf32>
    %104 = arith.mulf %100, %103 : vector<5x8xf32>
    %cst_41 = arith.constant 1.000000e+00 : f32
    %105 = vector.broadcast %cst_41 : f32 to vector<1x8xf32>
    %106 = arith.subf %105, %102 : vector<1x8xf32>
    %107 = vector.broadcast %106 : vector<1x8xf32> to vector<5x8xf32>
    %108 = arith.mulf %85, %107 : vector<5x8xf32>
    %109 = arith.addf %104, %108 : vector<5x8xf32>
    %c2_i32 = arith.constant 2 : i32
    %110 = vector.shape_cast %109 : vector<5x8xf32> to vector<5x1x8xf32>
    %111 = vector.broadcast %110 : vector<5x1x8xf32> to vector<5x5x8xf32>
    %112 = arith.addf %111, %80 : vector<5x5x8xf32>
    %cst_42 = arith.constant dense<0xFF800000> : vector<5x8xf32>
    %113 = vector.multi_reduction <maximumf>, %112, %cst_42 [0] : vector<5x5x8xf32> to vector<5x8xf32>
    %114 = vector.shape_cast %113 : vector<5x8xf32> to vector<1x5x8xf32>
    %115 = vector.broadcast %114 : vector<1x5x8xf32> to vector<5x5x8xf32>
    %116 = arith.subf %112, %115 : vector<5x5x8xf32>
    %117 = math.exp %116 : vector<5x5x8xf32>
    %cst_43 = arith.constant dense<0.000000e+00> : vector<5x8xf32>
    %118 = vector.multi_reduction <add>, %117, %cst_43 [0] : vector<5x5x8xf32> to vector<5x8xf32>
    %119 = math.log %118 : vector<5x8xf32>
    %120 = arith.addf %119, %113 : vector<5x8xf32>
    %121 = arith.index_cast %c2_i32 : i32 to index
    %c0_44 = arith.constant 0 : index
    %c0_45 = arith.constant 0 : index
    %122 = vector.load %arg11[%121, %c0_44, %c0_45] : memref<8x5x8xf32, #tpu.memory_space<vmem>>, vector<1x5x8xf32>
    %123 = vector.shape_cast %122 : vector<1x5x8xf32> to vector<5x8xf32>
    %124 = arith.addf %120, %123 : vector<5x8xf32>
    %125 = arith.index_cast %c2_i32 : i32 to index
    %c0_46 = arith.constant 0 : index
    %126 = vector.load %arg8[%125, %c0_46] : memref<8x8xf32, #tpu.memory_space<vmem>>, vector<1x8xf32>
    %127 = vector.broadcast %126 : vector<1x8xf32> to vector<5x8xf32>
    %128 = arith.mulf %124, %127 : vector<5x8xf32>
    %cst_47 = arith.constant 1.000000e+00 : f32
    %129 = vector.broadcast %cst_47 : f32 to vector<1x8xf32>
    %130 = arith.subf %129, %126 : vector<1x8xf32>
    %131 = vector.broadcast %130 : vector<1x8xf32> to vector<5x8xf32>
    %132 = arith.mulf %109, %131 : vector<5x8xf32>
    %133 = arith.addf %128, %132 : vector<5x8xf32>
    %c3_i32 = arith.constant 3 : i32
    %134 = vector.shape_cast %133 : vector<5x8xf32> to vector<5x1x8xf32>
    %135 = vector.broadcast %134 : vector<5x1x8xf32> to vector<5x5x8xf32>
    %136 = arith.addf %135, %80 : vector<5x5x8xf32>
    %cst_48 = arith.constant dense<0xFF800000> : vector<5x8xf32>
    %137 = vector.multi_reduction <maximumf>, %136, %cst_48 [0] : vector<5x5x8xf32> to vector<5x8xf32>
    %138 = vector.shape_cast %137 : vector<5x8xf32> to vector<1x5x8xf32>
    %139 = vector.broadcast %138 : vector<1x5x8xf32> to vector<5x5x8xf32>
    %140 = arith.subf %136, %139 : vector<5x5x8xf32>
    %141 = math.exp %140 : vector<5x5x8xf32>
    %cst_49 = arith.constant dense<0.000000e+00> : vector<5x8xf32>
    %142 = vector.multi_reduction <add>, %141, %cst_49 [0] : vector<5x5x8xf32> to vector<5x8xf32>
    %143 = math.log %142 : vector<5x8xf32>
    %144 = arith.addf %143, %137 : vector<5x8xf32>
    %145 = arith.index_cast %c3_i32 : i32 to index
    %c0_50 = arith.constant 0 : index
    %c0_51 = arith.constant 0 : index
    %146 = vector.load %arg11[%145, %c0_50, %c0_51] : memref<8x5x8xf32, #tpu.memory_space<vmem>>, vector<1x5x8xf32>
    %147 = vector.shape_cast %146 : vector<1x5x8xf32> to vector<5x8xf32>
    %148 = arith.addf %144, %147 : vector<5x8xf32>
    %149 = arith.index_cast %c3_i32 : i32 to index
    %c0_52 = arith.constant 0 : index
    %150 = vector.load %arg8[%149, %c0_52] : memref<8x8xf32, #tpu.memory_space<vmem>>, vector<1x8xf32>
    %151 = vector.broadcast %150 : vector<1x8xf32> to vector<5x8xf32>
    %152 = arith.mulf %148, %151 : vector<5x8xf32>
    %cst_53 = arith.constant 1.000000e+00 : f32
    %153 = vector.broadcast %cst_53 : f32 to vector<1x8xf32>
    %154 = arith.subf %153, %150 : vector<1x8xf32>
    %155 = vector.broadcast %154 : vector<1x8xf32> to vector<5x8xf32>
    %156 = arith.mulf %133, %155 : vector<5x8xf32>
    %157 = arith.addf %152, %156 : vector<5x8xf32>
    %c4_i32 = arith.constant 4 : i32
    %158 = vector.shape_cast %157 : vector<5x8xf32> to vector<5x1x8xf32>
    %159 = vector.broadcast %158 : vector<5x1x8xf32> to vector<5x5x8xf32>
    %160 = arith.addf %159, %80 : vector<5x5x8xf32>
    %cst_54 = arith.constant dense<0xFF800000> : vector<5x8xf32>
    %161 = vector.multi_reduction <maximumf>, %160, %cst_54 [0] : vector<5x5x8xf32> to vector<5x8xf32>
    %162 = vector.shape_cast %161 : vector<5x8xf32> to vector<1x5x8xf32>
    %163 = vector.broadcast %162 : vector<1x5x8xf32> to vector<5x5x8xf32>
    %164 = arith.subf %160, %163 : vector<5x5x8xf32>
    %165 = math.exp %164 : vector<5x5x8xf32>
    %cst_55 = arith.constant dense<0.000000e+00> : vector<5x8xf32>
    %166 = vector.multi_reduction <add>, %165, %cst_55 [0] : vector<5x5x8xf32> to vector<5x8xf32>
    %167 = math.log %166 : vector<5x8xf32>
    %168 = arith.addf %167, %161 : vector<5x8xf32>
    %169 = arith.index_cast %c4_i32 : i32 to index
    %c0_56 = arith.constant 0 : index
    %c0_57 = arith.constant 0 : index
    %170 = vector.load %arg11[%169, %c0_56, %c0_57] : memref<8x5x8xf32, #tpu.memory_space<vmem>>, vector<1x5x8xf32>
    %171 = vector.shape_cast %170 : vector<1x5x8xf32> to vector<5x8xf32>
    %172 = arith.addf %168, %171 : vector<5x8xf32>
    %173 = arith.index_cast %c4_i32 : i32 to index
    %c0_58 = arith.constant 0 : index
    %174 = vector.load %arg8[%173, %c0_58] : memref<8x8xf32, #tpu.memory_space<vmem>>, vector<1x8xf32>
    %175 = vector.broadcast %174 : vector<1x8xf32> to vector<5x8xf32>
    %176 = arith.mulf %172, %175 : vector<5x8xf32>
    %cst_59 = arith.constant 1.000000e+00 : f32
    %177 = vector.broadcast %cst_59 : f32 to vector<1x8xf32>
    %178 = arith.subf %177, %174 : vector<1x8xf32>
    %179 = vector.broadcast %178 : vector<1x8xf32> to vector<5x8xf32>
    %180 = arith.mulf %157, %179 : vector<5x8xf32>
    %181 = arith.addf %176, %180 : vector<5x8xf32>
    %c5_i32_60 = arith.constant 5 : i32
    %182 = vector.shape_cast %181 : vector<5x8xf32> to vector<5x1x8xf32>
    %183 = vector.broadcast %182 : vector<5x1x8xf32> to vector<5x5x8xf32>
    %184 = arith.addf %183, %80 : vector<5x5x8xf32>
    %cst_61 = arith.constant dense<0xFF800000> : vector<5x8xf32>
    %185 = vector.multi_reduction <maximumf>, %184, %cst_61 [0] : vector<5x5x8xf32> to vector<5x8xf32>
    %186 = vector.shape_cast %185 : vector<5x8xf32> to vector<1x5x8xf32>
    %187 = vector.broadcast %186 : vector<1x5x8xf32> to vector<5x5x8xf32>
    %188 = arith.subf %184, %187 : vector<5x5x8xf32>
    %189 = math.exp %188 : vector<5x5x8xf32>
    %cst_62 = arith.constant dense<0.000000e+00> : vector<5x8xf32>
    %190 = vector.multi_reduction <add>, %189, %cst_62 [0] : vector<5x5x8xf32> to vector<5x8xf32>
    %191 = math.log %190 : vector<5x8xf32>
    %192 = arith.addf %191, %185 : vector<5x8xf32>
    %193 = arith.index_cast %c5_i32_60 : i32 to index
    %c0_63 = arith.constant 0 : index
    %c0_64 = arith.constant 0 : index
    %194 = vector.load %arg11[%193, %c0_63, %c0_64] : memref<8x5x8xf32, #tpu.memory_space<vmem>>, vector<1x5x8xf32>
    %195 = vector.shape_cast %194 : vector<1x5x8xf32> to vector<5x8xf32>
    %196 = arith.addf %192, %195 : vector<5x8xf32>
    %197 = arith.index_cast %c5_i32_60 : i32 to index
    %c0_65 = arith.constant 0 : index
    %198 = vector.load %arg8[%197, %c0_65] : memref<8x8xf32, #tpu.memory_space<vmem>>, vector<1x8xf32>
    %199 = vector.broadcast %198 : vector<1x8xf32> to vector<5x8xf32>
    %200 = arith.mulf %196, %199 : vector<5x8xf32>
    %cst_66 = arith.constant 1.000000e+00 : f32
    %201 = vector.broadcast %cst_66 : f32 to vector<1x8xf32>
    %202 = arith.subf %201, %198 : vector<1x8xf32>
    %203 = vector.broadcast %202 : vector<1x8xf32> to vector<5x8xf32>
    %204 = arith.mulf %181, %203 : vector<5x8xf32>
    %205 = arith.addf %200, %204 : vector<5x8xf32>
    %c6_i32 = arith.constant 6 : i32
    %206 = vector.shape_cast %205 : vector<5x8xf32> to vector<5x1x8xf32>
    %207 = vector.broadcast %206 : vector<5x1x8xf32> to vector<5x5x8xf32>
    %208 = arith.addf %207, %80 : vector<5x5x8xf32>
    %cst_67 = arith.constant dense<0xFF800000> : vector<5x8xf32>
    %209 = vector.multi_reduction <maximumf>, %208, %cst_67 [0] : vector<5x5x8xf32> to vector<5x8xf32>
    %210 = vector.shape_cast %209 : vector<5x8xf32> to vector<1x5x8xf32>
    %211 = vector.broadcast %210 : vector<1x5x8xf32> to vector<5x5x8xf32>
    %212 = arith.subf %208, %211 : vector<5x5x8xf32>
    %213 = math.exp %212 : vector<5x5x8xf32>
    %cst_68 = arith.constant dense<0.000000e+00> : vector<5x8xf32>
    %214 = vector.multi_reduction <add>, %213, %cst_68 [0] : vector<5x5x8xf32> to vector<5x8xf32>
    %215 = math.log %214 : vector<5x8xf32>
    %216 = arith.addf %215, %209 : vector<5x8xf32>
    %217 = arith.index_cast %c6_i32 : i32 to index
    %c0_69 = arith.constant 0 : index
    %c0_70 = arith.constant 0 : index
    %218 = vector.load %arg11[%217, %c0_69, %c0_70] : memref<8x5x8xf32, #tpu.memory_space<vmem>>, vector<1x5x8xf32>
    %219 = vector.shape_cast %218 : vector<1x5x8xf32> to vector<5x8xf32>
    %220 = arith.addf %216, %219 : vector<5x8xf32>
    %221 = arith.index_cast %c6_i32 : i32 to index
    %c0_71 = arith.constant 0 : index
    %222 = vector.load %arg8[%221, %c0_71] : memref<8x8xf32, #tpu.memory_space<vmem>>, vector<1x8xf32>
    %223 = vector.broadcast %222 : vector<1x8xf32> to vector<5x8xf32>
    %224 = arith.mulf %220, %223 : vector<5x8xf32>
    %cst_72 = arith.constant 1.000000e+00 : f32
    %225 = vector.broadcast %cst_72 : f32 to vector<1x8xf32>
    %226 = arith.subf %225, %222 : vector<1x8xf32>
    %227 = vector.broadcast %226 : vector<1x8xf32> to vector<5x8xf32>
    %228 = arith.mulf %205, %227 : vector<5x8xf32>
    %229 = arith.addf %224, %228 : vector<5x8xf32>
    %c7_i32 = arith.constant 7 : i32
    %230 = vector.shape_cast %229 : vector<5x8xf32> to vector<5x1x8xf32>
    %231 = vector.broadcast %230 : vector<5x1x8xf32> to vector<5x5x8xf32>
    %232 = arith.addf %231, %80 : vector<5x5x8xf32>
    %cst_73 = arith.constant dense<0xFF800000> : vector<5x8xf32>
    %233 = vector.multi_reduction <maximumf>, %232, %cst_73 [0] : vector<5x5x8xf32> to vector<5x8xf32>
    %234 = vector.shape_cast %233 : vector<5x8xf32> to vector<1x5x8xf32>
    %235 = vector.broadcast %234 : vector<1x5x8xf32> to vector<5x5x8xf32>
    %236 = arith.subf %232, %235 : vector<5x5x8xf32>
    %237 = math.exp %236 : vector<5x5x8xf32>
    %cst_74 = arith.constant dense<0.000000e+00> : vector<5x8xf32>
    %238 = vector.multi_reduction <add>, %237, %cst_74 [0] : vector<5x5x8xf32> to vector<5x8xf32>
    %239 = math.log %238 : vector<5x8xf32>
    %240 = arith.addf %239, %233 : vector<5x8xf32>
    %241 = arith.index_cast %c7_i32 : i32 to index
    %c0_75 = arith.constant 0 : index
    %c0_76 = arith.constant 0 : index
    %242 = vector.load %arg11[%241, %c0_75, %c0_76] : memref<8x5x8xf32, #tpu.memory_space<vmem>>, vector<1x5x8xf32>
    %243 = vector.shape_cast %242 : vector<1x5x8xf32> to vector<5x8xf32>
    %244 = arith.addf %240, %243 : vector<5x8xf32>
    %245 = arith.index_cast %c7_i32 : i32 to index
    %c0_77 = arith.constant 0 : index
    %246 = vector.load %arg8[%245, %c0_77] : memref<8x8xf32, #tpu.memory_space<vmem>>, vector<1x8xf32>
    %247 = vector.broadcast %246 : vector<1x8xf32> to vector<5x8xf32>
    %248 = arith.mulf %244, %247 : vector<5x8xf32>
    %cst_78 = arith.constant 1.000000e+00 : f32
    %249 = vector.broadcast %cst_78 : f32 to vector<1x8xf32>
    %250 = arith.subf %249, %246 : vector<1x8xf32>
    %251 = vector.broadcast %250 : vector<1x8xf32> to vector<5x8xf32>
    %252 = arith.mulf %229, %251 : vector<5x8xf32>
    %253 = arith.addf %248, %252 : vector<5x8xf32>
    %c7_i32_79 = arith.constant 7 : i32
    %c0_80 = arith.constant 0 : index
    %c0_81 = arith.constant 0 : index
    %254 = vector.load %arg7[%c0_80, %c0_81] : memref<5x1xf32, #tpu.memory_space<vmem>>, vector<5x1xf32>
    %255 = vector.broadcast %254 : vector<5x1xf32> to vector<5x8xf32>
    %256 = arith.addf %253, %255 : vector<5x8xf32>
    %cst_82 = arith.constant dense<0xFF800000> : vector<8xf32>
    %257 = vector.multi_reduction <maximumf>, %256, %cst_82 [0] : vector<5x8xf32> to vector<8xf32>
    %258 = vector.shape_cast %257 : vector<8xf32> to vector<1x8xf32>
    %259 = vector.broadcast %258 : vector<1x8xf32> to vector<5x8xf32>
    %260 = arith.subf %256, %259 : vector<5x8xf32>
    %261 = math.exp %260 : vector<5x8xf32>
    %cst_83 = arith.constant dense<0.000000e+00> : vector<8xf32>
    %262 = vector.multi_reduction <add>, %261, %cst_83 [0] : vector<5x8xf32> to vector<8xf32>
    %263 = vector.shape_cast %262 : vector<8xf32> to vector<1x8xf32>
    %264 = math.log %263 : vector<1x8xf32>
    %265 = arith.addf %264, %258 : vector<1x8xf32>
    %cst_84 = arith.constant 0.000000e+00 : f32
    %266 = vector.broadcast %cst_84 : f32 to vector<1x8xf32>
    %267 = arith.cmpf ogt, %55, %266 : vector<1x8xf32>
    %268 = arith.extui %267 : vector<1x8xi1> to vector<1x8xi32>
    %269 = arith.sitofp %268 : vector<1x8xi32> to vector<1x8xf32>
    %270 = arith.subf %77, %265 : vector<1x8xf32>
    %cst_85 = arith.constant 0.000000e+00 : f32
    %271 = vector.broadcast %cst_85 : f32 to vector<1x8xf32>
    %272 = arith.subf %271, %270 : vector<1x8xf32>
    %273 = arith.mulf %272, %269 : vector<1x8xf32>
    %274 = vector.shape_cast %273 : vector<1x8xf32> to vector<1x1x8xf32>
    %c0_86 = arith.constant 0 : index
    %c0_87 = arith.constant 0 : index
    %c0_88 = arith.constant 0 : index
    %275 = vector.load %arg10[%c0_86, %c0_87, %c0_88] : memref<1x1x8xf32, #tpu.memory_space<vmem>>, vector<1x1x8xf32>
    tpu.vector_store %arg10[%c0_86, %c0_87, %c0_88], %274 {strides = array<i32>} : memref<1x1x8xf32, #tpu.memory_space<vmem>>, vector<1x1x8xf32>,
    return
  }
  func.func @transform_0(%arg0: i32) -> (i32, i32, i32) {
    %c0_i32 = arith.constant 0 : i32
    %c0_i32_0 = arith.constant 0 : i32
    %c0_i32_1 = arith.constant 0 : i32
    return %c0_i32, %arg0, %c0_i32_0 : i32, i32, i32
  }
  func.func @transform_1(%arg0: i32) -> (i32, i32) {
    %c0_i32 = arith.constant 0 : i32
    %c0_i32_0 = arith.constant 0 : i32
    %c0_i32_1 = arith.constant 0 : i32
    return %c0_i32, %c0_i32_0 : i32, i32
  }
  func.func @transform_2(%arg0: i32) -> (i32, i32) {
    %c0_i32 = arith.constant 0 : i32
    %c0_i32_0 = arith.constant 0 : i32
    %c0_i32_1 = arith.constant 0 : i32
    return %c0_i32, %c0_i32_0 : i32, i32
  }
  func.func @transform_3(%arg0: i32) -> (i32, i32, i32) {
    %c0_i32 = arith.constant 0 : i32
    %c0_i32_0 = arith.constant 0 : i32
    %c0_i32_1 = arith.constant 0 : i32
    %c0_i32_2 = arith.constant 0 : i32
    return %c0_i32, %c0_i32_0, %c0_i32_1 : i32, i32, i32
  }
  func.func @transform_4(%arg0: i32) -> (i32, i32) {
    %c0_i32 = arith.constant 0 : i32
    %c0_i32_0 = arith.constant 0 : i32
    %c0_i32_1 = arith.constant 0 : i32
    return %c0_i32, %c0_i32_0 : i32, i32
  }
  func.func @transform_5(%arg0: i32) -> (i32, i32) {
    %c0_i32 = arith.constant 0 : i32
    %c0_i32_0 = arith.constant 0 : i32
    %c0_i32_1 = arith.constant 0 : i32
    return %c0_i32, %c0_i32_0 : i32, i32
  }
  func.func @transform_6(%arg0: i32) -> (i32, i32) {
    %c0_i32 = arith.constant 0 : i32
    %c0_i32_0 = arith.constant 0 : i32
    %c0_i32_1 = arith.constant 0 : i32
    return %c0_i32, %c0_i32_0 : i32, i32
  }
  func.func @transform_7(%arg0: i32) -> (i32, i32) {
    %c0_i32 = arith.constant 0 : i32
    %c0_i32_0 = arith.constant 0 : i32
    return %c0_i32, %arg0 : i32, i32
  }
  func.func @transform_8(%arg0: i32) -> (i32, i32) {
    %c0_i32 = arith.constant 0 : i32
    %c0_i32_0 = arith.constant 0 : i32
    return %c0_i32, %arg0 : i32, i32
  }
  func.func @transform_9(%arg0: i32) -> (i32, i32, i32) {
    %c0_i32 = arith.constant 0 : i32
    %c0_i32_0 = arith.constant 0 : i32
    %c0_i32_1 = arith.constant 0 : i32
    return %arg0, %c0_i32, %c0_i32_0 : i32, i32, i32
  }
}

</mosaic_0001>

<bundles_post_ra>
// kernel: tpu_custom_call.1
= control target key start
LH: loop header
LB: loop body
LE: loop exit
PB: predicated region body
PF: predicated region fallthrough
CT: control target
= control target key end

     0   :  { %vm52_vm0 = vcmask 261120   ;;  %v2229_v6 = vmov 0   ;;  %s3122_s0 = inlined_call_operand.vmem [shape: f32[8,8,32], index: 0, kind: input, shape index: {}]   ;;  %s3123_s1 = inlined_call_operand.vmem [shape: f32[32,5], index: 1, kind: input, shape index: {}]   ;;  %s3124_s2 = inlined_call_operand.vmem [shape: f32[1,5], index: 2, kind: input, shape index: {}]   ;;  %s3125_s3 = inlined_call_operand.vmem [shape: f32[5,5,1], index: 3, kind: input, shape index: {}]   ;;  %s3126_s4 = inlined_call_operand.vmem [shape: f32[25,1], index: 4, kind: input, shape index: {}]   ;;  %s3127_s5 = inlined_call_operand.vmem [shape: f32[5,1], index: 5, kind: input, shape index: {}]   ;;  %s3128_s6 = inlined_call_operand.vmem [shape: f32[5,1], index: 6, kind: input, shape index: {}]   ;;  %s3129_s7 = inlined_call_operand.vmem [shape: f32[8,8], index: 7, kind: input, shape index: {}]   ;;  %s3130_s8 = inlined_call_operand.vmem [shape: s32[8,8], index: 8, kind: input, shape index: {}]   ;;  %s3131_s9 = inlined_call_operand.hbm [shape: f32[1,1,8], index: 9, kind: output, shape index: {}]  }
   0x1   :  { %v41_v0 = vld [vmem:[%s3123_s1] sm:$0xff]  ;;  %v42_v1 = vld [vmem:[%s3123_s1 + $0x8] sm:$0xff]  ;;  %v43_v2 = vld [vmem:[%s3123_s1 + $0x10] sm:$0xff]  ;;  %2114 = vset.pattern.permute.xlu1 %v2229_v6  ;;  %2113 = vset.pattern.permute.xlu0 %v2229_v6 }
   0x2   :  { %v2095_v3 = vpack.c.bf16 %v42_v1, %v41_v0  ;;  %v44_v4 = vld [vmem:[%s3123_s1 + $0x18] sm:$0xff]  ;;  %v33_v5 = vld [vmem:[%s3122_s0] sm:$0xff] }
   0x3   :  { %v2099_v7 = vpack.c.bf16 %v44_v4, %v43_v2  ;;  %2083 = vmatprep.mubr.msk.f32.mxu0 %vm52_vm0, %v33_v5  ;;  %v37_v8 = vld [vmem:[%s3122_s0 + $0x20] sm:$0xff] }
   0x4   :  { %2096 = vmatprep.subr.bf16.mxu0 %v2095_v3  ;;  %2103 = vmatprep.subr.bf16.mxu1 %v2095_v3  ;;  %v1090_v9 = vld [vmem:[%s3125_s3 + $0x20] sm:$0x1f] }
   0x5   :  { %2098 = vmatpush3.bf16.msra.mxu0 %v2095_v3  ;;  %2105 = vmatpush3.bf16.msra.mxu1 %v2095_v3  ;;  %v1034_v10 = vld [vmem:[%s3127_s5] sm:$0x1f] }
   0x6   :  { %2100 = vmatprep.subr.bf16.mxu0 %v2099_v7  ;;  %2104 = vmatprep.subr.bf16.mxu1 %v2099_v7 }
   0x7   :  { %2089 = vmatprep.mubr.msk.f32.mxu1 %vm52_vm0, %v37_v8  ;;  %1113 = vperm.xlu1 %2114, %v1090_v9  }
   0x8   :  { %14 = vsyncpa [#allocation4], 0  ;;  %v1087_v11 = vld [vmem:[%s3125_s3 + $0x8] sm:$0x1f]  ;;  %1037 = vperm.xlu0 %2113, %v1034_v10   ;;  %v35_v14 = vld [vmem:[%s3122_s0 + $0x10] sm:$0xff]  ;;  %v449_v45 = vlaneseq  ;;  %vm438_vm1 = vcmask 61440  }
   0x9   :  { %2102 = vmatpush3.bf16.msra.mxu0 %v2099_v7  ;;  %v34_v12 = vld [vmem:[%s3122_s0 + $0x8] sm:$0xff]  ;;  %2106 = vmatpush3.bf16.msra.mxu1 %v2099_v7  ;;  %v39_v15 = vld [vmem:[%s3122_s0 + $0x30] sm:$0xff]  ;;  %v1086_v16 = vld [vmem:[%s3125_s3] sm:$0x1f]  ;;  %v2230_v43 = vmov 1966171168  }
   0xa   :  { %v38_v13 = vld [vmem:[%s3122_s0 + $0x28] sm:$0xff]  ;;  %v1089_v17 = vld [vmem:[%s3125_s3 + $0x18] sm:$0x1f]  ;;  %v1088_v20 = vld [vmem:[%s3125_s3 + $0x10] sm:$0x1f]  ;;  %v453_v44 = vunpack.c.l.s4 %v2230_v43  ;;  %v2363_v47 = vshrl.u32 %v449_v45, 7 }
   0xb   :  { %1098 = vperm.xlu1 %2114, %v1087_v11   ;;  %v36_v18 = vld [vmem:[%s3122_s0 + $0x18] sm:$0xff]  ;;  %v2014_v21 = vld [vmem:[%s3124_s2] ss:$0 sm:$0xff]  ;;  %v849_v39 = vld [vmem:[%s3126_s4 + $0x8] sm:$0xff] }
   0xc   :  { %2084 = vmatmul.mubr.msk.f32.vlgmr.msra.gmra.mrb[0].mxu0 %vm52_vm0, %v34_v12  ;;  %2090 = vmatmul.mubr.msk.f32.vlgmr.msra.gmra.mrb[0].mxu1 %vm52_vm0, %v38_v13  ;;  %v40_v19 = vld [vmem:[%s3122_s0 + $0x38] sm:$0xff]  ;;  %v1069_v38 = vld [vmem:[%s3128_s6] sm:$0x1f]  ;;  %v850_v40 = vld [vmem:[%s3126_s4 + $0x10] sm:$0xff]  ;;  %v454_v46 = vunpack.c.0.s8 %v453_v44  ;;  %v2388_v2 = vsub.s32 0, %v2363_v47 }
   0xd   :  { %2086 = vmatprep.mubr.msk.f32.mxu0 %vm52_vm0, %v35_v14  ;;  %2092 = vmatprep.mubr.msk.f32.mxu1 %vm52_vm0, %v39_v15  ;;  %v851_v41 = vld [vmem:[%s3126_s4 + $0x18] sm:$0x1]  ;;  %v848_v42 = vld [vmem:[%s3126_s4] sm:$0xff] }
   0xe   :  { %1093 = vperm.xlu0 %2113, %v1086_v16   ;;  %v2366_v48 = vsub.s32 %v454_v46, %v2363_v47  ;;  %v2371_v49 = vld [vmem:[%s3130_s8] sm:$0xff] }
   0xf   :  { %1108 = vperm.xlu1 %2114, %v1089_v17   ;;  %v682_v50 = vmul.u32 5, %v2371_v49  ;;  %v683_v51 = vrot.slane %v2371_v49, 1  ;;  %v451_v53 = vcombine.high %v2371_v49, %v2371_v49  ;;  %v2401_v9 = vld [vmem:[%s3129_s7 + $0x1] sm:$0x1] }
  0x10   :  { %2087 = vmatmul.mubr.msk.f32.gmra.mrb[2].mxu0 %vm52_vm0, %v36_v18  ;;  %2093 = vmatmul.mubr.msk.f32.gmra.mrb[2].mxu1 %vm52_vm0, %v40_v19  ;;  %v458_v52 = vrot.slane %v2371_v49, %v2366_v48  ;;  %v1233_v18 = vsub.f32 1.0, %v2401_v9 }
  0x11   :  { %v684_v54 = vadd.s32 %v683_v51, %v682_v50  ;;  %v465_v56 = vrot.slane %v451_v53, %v2366_v48 }
  0x12   :  { %1103 = vperm.xlu0 %2113, %v1088_v20   ;;  %v466_v55 = vcombine.high %v458_v52, %v458_v52  ;;  %v474_v60 = vrot.slane %v458_v52, %v2366_v48 }
  0x13   :  { %v695_v58 = vrot.slane %v684_v54, %v2366_v48  ;;  %v467_v61 = vcombine.high %v465_v56, %v465_v56  ;;  %v688_v63 = vcombine.high %v684_v54, %v684_v54  ;;  %v481_v3 = vrot.slane %v465_v56, %v2366_v48 }
  0x14   :  { %v488_v59 = vrot.slane %v466_v55, %v2366_v48  ;;  %v496_v0 = vcombine.high %v474_v60, %v474_v60  ;;  %v503_v8 = vrot.slane %v474_v60, %v2388_v2 }
  0x15   :  { %v703_v4 = vcombine.high %v695_v58, %v695_v58  ;;  %v2394_v6 = vrot.slane %v467_v61, %v2366_v48  ;;  %v497_v10 = vcombine.high %v481_v3, %v481_v3  ;;  %v702_v11 = vrot.slane %v688_v63, %v2366_v48 }
  0x16   :  { %v498_v1 = vcombine.high %v488_v59, %v488_v59  ;;  %v507_v7 = vrot.slane %v488_v59, %v2388_v2  ;;  %v511_v12 = vrot.slane %v496_v0, %v2388_v2  ;;  %v519_v15 = vrot.slane %v481_v3, %v2388_v2 }
  0x17   :  { %v711_v16 = vrot.slane %v695_v58, %v2366_v48  ;;  %v725_v17 = vrot.slane %v703_v4, %v2366_v48  ;;  %v523_v19 = vrot.slane %v2394_v6, %v2388_v2  ;;  %vm532_vm3 = vcmp.eq.s32.totalorder %v2363_v47, %v503_v8 }
  0x18   :  { %v515_v13 = vrot.slane %v498_v1, %v2388_v2  ;;  %vm533_vm2 = vcmp.eq.s32.totalorder %v2363_v47, %v507_v7  ;;  %v527_v20 = vrot.slane %v497_v10, %v2388_v2  ;;  %vm534_vm4 = vcmp.eq.s32.totalorder %v2363_v47, %v511_v12 }
  0x19   :  { %vm536_vm6 = vcmp.eq.s32.totalorder %v2363_v47, %v519_v15  ;;  %vm537_vm7 = vcmp.eq.s32.totalorder %v2363_v47, %v523_v19  ;;  %v2496_v4 = vadd.s32 16, %v2363_v47 }
  0x1a   :  { %vm535_vm5 = vcmp.eq.s32.totalorder %v2363_v47, %v515_v13  ;;  %vm538_vm8 = vcmp.eq.s32.totalorder %v2363_v47, %v527_v20 }
  0x86   :  { %v2380_v57 = vpop.permute.xlu1 %1113 }
  0x87   :  { %v2385_v62 = vpop.permute.xlu0 %1037 }
  0x8a   :  { %v2391_v5 = vpop.permute.xlu1 %1098 }
  0x8d   :  { %v2406_v14 = vpop.permute.xlu0 %1093 }
  0xdf   :  { %v2085_v22 = vpop.f32.mrb[0].mxu0  ;;  %v2091_v23 = vpop.f32.mrb[0].mxu1 }
  0xe0   :  { %v149_v24 = vadd.f32 %v2085_v22, %v2014_v21  ;;  %v143_v25 = vpop.f32.mrb[1].mxu0  ;;  %v163_v26 = vpop.f32.mrb[1].mxu1  ;;  %v169_v28 = vadd.f32 %v2091_v23, %v2014_v21 }
  0xe1   :  { %v144_v27 = vadd.f32 %v2014_v21, %v143_v25  ;;  %v164_v36 = vadd.f32 %v2014_v21, %v163_v26  ;;  %v2419_v23 = vpop.permute.xlu1 %1108  ;;  %v718_v25 = vrot.slane %v702_v11, %v2366_v48 }
  0xe2   :  { %214 = vxpose.xlu1.b32.start.end [1/1] (short) (narrow) %v149_v24, 8  ;;  %v2424_v24 = vld [vmem:[%s3129_s7] sm:$0xff] }
  0xe3   :  { %v2088_v29 = vpop.f32.mrb[2].mxu0  ;;  %182 = vxpose.xlu0.b32.start.end [1/1] (short) (narrow) %v144_v27, 8  ;;  %v2094_v30 = vpop.f32.mrb[2].mxu1  ;;  %v3132_v26 = vrot.slane %v2424_v24, 1  ;;  %v733_v27 = vcombine.high %v711_v16, %v711_v16  ;;  %v3133_v46 = vrot.slane %v2424_v24, 2  ;;  %v3134_v50 = vrot.slane %v2424_v24, 3 }
  0xe4   :  { %v153_v31 = vpop.f32.mrb[3].mxu0  ;;  %v179_v32 = vadd.f32 %v2094_v30, %v2014_v21  ;;  %v173_v33 = vpop.f32.mrb[3].mxu1  ;;  %v159_v35 = vadd.f32 %v2088_v29, %v2014_v21  ;;  %v2231_v29 = vmov 0.0   ;;  %v2470_v52 = vrot.slane %v718_v25, %v2388_v2 }
  0xe5   :  { %v154_v34 = vadd.f32 %v2014_v21, %v153_v31  ;;  %v174_v37 = vadd.f32 %v2014_v21, %v173_v33  ;;  %v704_v21 = vcombine.high %v702_v11, %v702_v11  ;;  %v2024_v30 = vsel %vm533_vm2, 1.0, %v2231_v29  ;;  %v2437_v33 = vpop.permute.xlu0 %1103 }
  0xe6   :  { %342 = vxpose.xlu1.b32.start.end [1/1] (short) (narrow) %v169_v28, 8  ;;  %v735_v28 = vcombine.high %v725_v17, %v725_v17  ;;  %v2023_v31 = vsel %vm532_vm3, 1.0, %v2231_v29  ;;  %v2459_v43 = vrot.slane %v733_v27, %v2388_v2  ;;  %v2467_v51 = vsel %vm538_vm8, 1.0, %v2231_v29 }
  0xe7   :  { %246 = vxpose.xlu0.b32.start.end [1/1] (short) (narrow) %v154_v34, 8  ;;  %v2025_v34 = vsel %vm534_vm4, 1.0, %v2231_v29  ;;  %vm653_vm2 = vcmask 1041409   ;;  %vm656_vm4 = vcmask 1042434  }
  0xe8   :  { %v2462_v44 = vrot.slane %v735_v28, %v2388_v2 }
  0xeb   :  { %278 = vxpose.xlu0.b32.start.end [1/1] (short) (narrow) %v159_v35, 8  ;;  %v2441_v35 = vsel %vm535_vm5, 1.0, %v2231_v29  ;;  %vm774_vm5 = vcmp.eq.s32.totalorder %v2496_v4, %v2459_v43 }
  0xef   :  { %310 = vxpose.xlu0.b32.start.end [1/1] (short) (narrow) %v164_v36, 8  ;;  %v732_v36 = vrot.slane %v704_v21, %v2366_v48 }
  0xf1   :  { %v2476_v58 = vrot.slane %v732_v36, %v2388_v2 }
  0xf3   :  { %374 = vxpose.xlu0.b32.start.end [1/1] (short) (narrow) %v174_v37, 8  ;;  %v2446_v37 = vsel %vm536_vm6, 1.0, %v2231_v29  ;;  %vm778_vm6 = vcmp.eq.s32.totalorder %v2496_v4, %v2462_v44  ;;  %vm786_vm8 = vcmp.eq.s32.totalorder %v2496_v4, %v2476_v58 }
 0x104   :  { %1072 = vperm.xlu1 %2114, %v1069_v38   ;;  %v2449_v38 = vadd.s32 8, %v2363_v47 }
 0x106   :  { %vm773_vm11 = vcmp.eq.s32.totalorder %v2449_v38, %v2459_v43  ;;  %vm777_vm12 = vcmp.eq.s32.totalorder %v2449_v38, %v2462_v44  ;;  %vm781_vm13 = vcmp.eq.s32.totalorder %v2449_v38, %v2470_v52  ;;  %vm785_vm14 = vcmp.eq.s32.totalorder %v2449_v38, %v2476_v58 }
 0x107   :  { %v2524_v19 = vsel %vm777_vm12, 1.0, %v2231_v29  ;;  %vm3135_vm12 = vcmask 1045509  }
 0x108   :  { %859 = vperm.xlu1 %2114, %v849_v39   ;;  %v734_v39 = vcombine.high %v718_v25, %v718_v25  ;;  %v2531_v25 = vsel %vm781_vm13, 1.0, %v2231_v29 }
 0x10a   :  { %v2481_v61 = vrot.slane %v734_v39, %v2388_v2 }
 0x10c   :  { %864 = vperm.xlu1 %2114, %v850_v40   ;;  %v2452_v40 = vrot.slane %v711_v16, %v2388_v2  ;;  %vm789_vm15 = vcmp.eq.s32.totalorder %v2449_v38, %v2481_v61 }
 0x10e   :  { %vm765_vm9 = vcmp.eq.s32.totalorder %v2449_v38, %v2452_v40  ;;  %vm766_vm0 = vcmp.eq.s32.totalorder %v2496_v4, %v2452_v40 }
 0x10f   :  { %v2502_v11 = vsel %vm765_vm9, 1.0, %v2231_v29  ;;  %vm659_vm9 = vcmask 1043459  }
 0x110   :  { %869 = vperm.xlu1 %2114, %v851_v41   ;;  %v2028_v41 = vsel %vm537_vm7, 1.0, %v2231_v29  ;;  %vm782_vm7 = vcmp.eq.s32.totalorder %v2496_v4, %v2470_v52 }
 0x11c   :  { %854 = vperm.xlu0 %2113, %v848_v42   ;;  %v2456_v42 = vrot.slane %v725_v17, %v2388_v2 }
 0x11e   :  { %vm769_vm10 = vcmp.eq.s32.totalorder %v2449_v38, %v2456_v42  ;;  %vm770_vm3 = vcmp.eq.s32.totalorder %v2496_v4, %v2456_v42 }
 0x11f   :  { %v2511_v15 = vsel %vm769_vm10, 1.0, %v2231_v29  ;;  %vm790_vm10 = vcmp.eq.s32.totalorder %v2496_v4, %v2481_v61 }
 0x13a   :  { %406 = vxpose.xlu0.b32.start.end [1/1] (short) (narrow) %v179_v32, 8  ;;  %v2434_v32 = vrot.slane %v1233_v18, %v2388_v2  ;;  %v2518_v18 = vsel %vm773_vm11, 1.0, %v2231_v29  ;;  %vm662_vm11 = vcmask 1044484  }
 0x162   :  { %v230_v45 = vpop.trf.xlu1 }
 0x163   :  { %440 = vst.msk [vmem:[#allocation2 + $0x8] sm:$0x1f] %vm438_vm1, %v230_v45  ;;  %v557_v53 = vmul.f32 %v2024_v30, %v230_v45  ;;  %v198_v54 = vpop.trf.xlu0  ;;  %v2546_v45 = vsel %vm785_vm14, 1.0, %v2231_v29 }
 0x164   :  { %439 = vst.msk [vmem:[#allocation2] sm:$0x1f] %vm438_vm1, %v198_v54  ;;  %v556_v59 = vmul.f32 %v2023_v31, %v198_v54 }
 0x165   :  { %v571_v63 = vsel %vm438_vm1, %v557_v53, 0.0 }
 0x166   :  { %v572_v0 = vrot.slane %v571_v63, 4  ;;  %v564_v1 = vsel %vm438_vm1, %v556_v59, 0.0  ;;  %v358_v3 = vpop.trf.xlu1  ;;  %v2552_v59 = vsel %vm789_vm15, 1.0, %v2231_v29  ;;  %vm668_vm15 = vcmask 1046534  }
 0x167   :  { %v565_v7 = vrot.slane %v564_v1, 4  ;;  %v262_v8 = vpop.trf.xlu0  ;;  %444 = vst.msk [vmem:[#allocation2 + $0x28] sm:$0x1f] %vm438_vm1, %v358_v3  ;;  %v561_v10 = vmul.f32 %v2028_v41, %v358_v3  ;;  %v2565_v3 = vsel %vm770_vm3, 1.0, %v2231_v29 }
 0x168   :  { %v573_v12 = vadd.f32 %v572_v0, %v571_v63  ;;  %441 = vst.msk [vmem:[#allocation2 + $0x10] sm:$0x1f] %vm438_vm1, %v262_v8  ;;  %v558_v13 = vmul.f32 %v2025_v34, %v262_v8  ;;  %v2558_v63 = vsel %vm766_vm0, 1.0, %v2231_v29 }
 0x169   :  { %v566_v16 = vadd.f32 %v565_v7, %v564_v1  ;;  %v599_v17 = vsel %vm438_vm1, %v561_v10, 0.0 }
 0x16a   :  { %v574_v20 = vrot.slane %v573_v12, 2  ;;  %v578_v21 = vsel %vm438_vm1, %v558_v13, 0.0  ;;  %v600_v34 = vrot.slane %v599_v17, 4 }
 0x16b   :  { %v567_v27 = vrot.slane %v566_v16, 2  ;;  %v1116_v28 = vld [vmem:[#allocation2] sm:$0x1f]  ;;  %v579_v30 = vrot.slane %v578_v21, 4  ;;  %v294_v31 = vpop.trf.xlu0 }
 0x16c   :  { %v575_v36 = vadd.f32 %v574_v20, %v573_v12  ;;  %v2538_v39 = vadd.f32 %v1116_v28, %v2385_v62  ;;  %442 = vst.msk [vmem:[#allocation2 + $0x18] sm:$0x1f] %vm438_vm1, %v294_v31  ;;  %v559_v41 = vmul.f32 %v2441_v35, %v294_v31  ;;  %v601_v12 = vadd.f32 %v600_v34, %v599_v17 }
 0x16d   :  { %v568_v53 = vadd.f32 %v567_v27, %v566_v16  ;;  %v580_v54 = vadd.f32 %v579_v30, %v578_v21 }
 0x16e   :  { %v576_v35 = vrot.slane %v575_v36, 1  ;;  %v1119_v0 = vcombine.high %v2538_v39, %v2538_v39  ;;  %v1126_v1 = vrot.slane %v2538_v39, %v2366_v48  ;;  %v585_v8 = vsel %vm438_vm1, %v559_v41, 0.0 }
 0x16f   :  { %v569_v7 = vrot.slane %v568_v53, 1  ;;  %v581_v38 = vrot.slane %v580_v54, 2  ;;  %v326_v10 = vpop.trf.xlu0  ;;  %v586_v30 = vrot.slane %v585_v8, 4 }
 0x170   :  { %v577_v13 = vadd.f32 %v576_v35, %v575_v36  ;;  %v1133_v16 = vrot.slane %v1119_v0, %v2366_v48  ;;  %v1134_v20 = vcombine.high %v1126_v1, %v1126_v1  ;;  %v1141_v21 = vrot.slane %v1126_v1, %v2366_v48  ;;  %443 = vst.msk [vmem:[#allocation2 + $0x20] sm:$0x1f] %vm438_vm1, %v326_v10 }
 0x171   :  { %v570_v27 = vadd.f32 %v569_v7, %v568_v53  ;;  %v582_v28 = vadd.f32 %v581_v38, %v580_v54  ;;  %v560_v31 = vmul.f32 %v2446_v37, %v326_v10  ;;  %v587_v37 = vadd.f32 %v586_v30, %v585_v8 }
 0x172   :  { %v637_v17 = vmul.f32 %v3132_v26, %v577_v13  ;;  %v1148_v34 = vrot.slane %v1133_v16, %v2366_v48  ;;  %v1155_v36 = vrot.slane %v1134_v20, %v2366_v48  ;;  %v1156_v41 = vcombine.high %v1141_v21, %v1141_v21 }
 0x173   :  { %v636_v53 = vmul.f32 %v570_v27, %v2424_v24  ;;  %v1161_v54 = vrot.slane %v1141_v21, %v2388_v2  ;;  %v583_v35 = vrot.slane %v582_v28, 1  ;;  %v390_v0 = vpop.trf.xlu0  ;;  %v588_v20 = vrot.slane %v587_v37, 2 }
 0x174   :  { %v652_v1 = vrot.slane %v637_v17, 7  ;;  %v1157_v7 = vcombine.high %v1155_v36, %v1155_v36  ;;  %v1165_v38 = vrot.slane %v1155_v36, %v2388_v2  ;;  %v1169_v10 = vrot.slane %v1156_v41, %v2388_v2  ;;  %445 = vst.msk [vmem:[#allocation2 + $0x30] sm:$0x1f] %vm438_vm1, %v390_v0 }
 0x175   :  { %v1177_v13 = vrot.slane %v1148_v34, %v2388_v2  ;;  %v1183_v16 = vadd.f32 %v1161_v54, %v2406_v14  ;;  %v584_v8 = vadd.f32 %v583_v35, %v582_v28  ;;  %v589_v26 = vadd.f32 %v588_v20, %v587_v37 }
 0x176   :  { %v654_v21 = vsel %vm653_vm2, %v652_v1, %v636_v53  ;;  %v1173_v27 = vrot.slane %v1157_v7, %v2388_v2  ;;  %v1184_v30 = vadd.f32 %v1165_v38, %v2391_v5  ;;  %v1185_v17 = vadd.f32 %v1169_v10, %v2437_v33 }
 0x177   :  { %v1187_v36 = vadd.f32 %v1177_v13, %v2380_v57  ;;  %v1188_v41 = vsel %vm438_vm1, %v1183_v16, -inf  ;;  %v638_v34 = vmul.f32 %v3133_v46, %v584_v8  ;;  %v592_v35 = vsel %vm438_vm1, %v560_v31, 0.0 }
 0x178   :  { %v1186_v28 = vadd.f32 %v1173_v27, %v2419_v23  ;;  %v1189_v54 = vsel %vm438_vm1, %v1184_v30, -inf  ;;  %v1190_v53 = vsel %vm438_vm1, %v1185_v17, -inf  ;;  %v590_v38 = vrot.slane %v589_v26, 1 }
 0x179   :  { %v1192_v1 = vsel %vm438_vm1, %v1187_v36, -inf  ;;  %v655_v7 = vrot.slane %v638_v34, 6  ;;  %v593_v10 = vrot.slane %v592_v35, 4  ;;  %v602_v37 = vrot.slane %v601_v12, 2 }
 0x17a   :  { %v1191_v13 = vsel %vm438_vm1, %v1186_v28, -inf  ;;  %v1193_v8 = vmax.f32 %v1188_v41, %v1192_v1  ;;  %v562_v20 = vmul.f32 %v2467_v51, %v390_v0  ;;  %v591_v22 = vadd.f32 %v590_v38, %v589_v26 }
 0x17b   :  { %v1195_v27 = vmax.f32 %v1190_v53, %v1191_v13  ;;  %v657_v46 = vsel %vm656_vm4, %v655_v7, %v654_v21  ;;  %v594_v60 = vadd.f32 %v593_v10, %v592_v35  ;;  %v603_v55 = vadd.f32 %v602_v37, %v601_v12 }
 0x17c   :  { %v1194_v31 = vmax.f32 %v1193_v8, %v1189_v54  ;;  %v606_v56 = vsel %vm438_vm1, %v562_v20, 0.0  ;;  %v2614_v34 = vsel %vm774_vm5, 1.0, %v2231_v29  ;;  %v639_v41 = vmul.f32 %v3134_v50, %v591_v22 }
 0x17d   :  { %v595_v1 = vrot.slane %v594_v60, 2  ;;  %v607_v51 = vrot.slane %v606_v56, 4  ;;  %v2622_v26 = vsel %vm778_vm6, 1.0, %v2231_v29  ;;  %v604_v0 = vrot.slane %v603_v55, 1 }
 0x17e   :  { %v2624_v12 = vmax.f32 %v1194_v31, %v1195_v27  ;;  %v2630_v21 = vsel %vm782_vm7, 1.0, %v2231_v29  ;;  %v2636_v22 = vsel %vm786_vm8, 1.0, %v2231_v29  ;;  %v658_v54 = vrot.slane %v639_v41, 5 }
 0x17f   :  { %v596_v53 = vadd.f32 %v595_v1, %v594_v60  ;;  %v608_v35 = vadd.f32 %v607_v51, %v606_v56  ;;  %v687_v7 = vadd.s32 24, %v2363_v47  ;;  %v605_v31 = vadd.f32 %v604_v0, %v603_v55 }
 0x180   :  { %v1197_v38 = vsub.f32 %v1183_v16, %v2624_v12  ;;  %v1198_v10 = vsub.f32 %v1184_v30, %v2624_v12  ;;  %v1199_v13 = vsub.f32 %v1185_v17, %v2624_v12  ;;  %v1200_v8 = vsub.f32 %v1186_v28, %v2624_v12 }
 0x181   :  { %v1201_v37 = vsub.f32 %v1187_v36, %v2624_v12  ;;  %v660_v20 = vsel %vm659_vm9, %v658_v54, %v657_v46  ;;  %v597_v27 = vrot.slane %v596_v53, 1  ;;  %v1231_v60 = vrot.slane %v2401_v9, %v2388_v2 }
 0x182   :  { %v1202_v56 = vmul.f32 1.442695, %v1197_v38  ;;  %v1204_v41 = vmul.f32 1.442695, %v1198_v10  ;;  %v1206_v1 = vmul.f32 1.442695, %v1199_v13  ;;  %vm767_vm13 = vcmp.eq.s32.totalorder %v687_v7, %v2452_v40 }
 0x183   :  { %v1208_v51 = vmul.f32 1.442695, %v1200_v8  ;;  %v598_v16 = vadd.f32 %v597_v27, %v596_v53  ;;  %v3136_v30 = vrot.slane %v2424_v24, 5  ;;  %v2649_v17 = vpop.permute.xlu1 %1072  ;;  %v2655_v46 = vsel %vm790_vm10, 1.0, %v2231_v29 }
 0x184   :  { %2115 = vpow2.f32 %v1202_v56  ;;  %v609_v55 = vrot.slane %v608_v35, 2  ;;  %vm771_vm14 = vcmp.eq.s32.totalorder %v687_v7, %v2456_v42  ;;  %v1210_v36 = vmul.f32 1.442695, %v1201_v37 }
 0x185   :  { %v641_v50 = vmul.f32 %v3136_v30, %v605_v31  ;;  %2117 = vpow2.f32 %v1204_v41  ;;  %v3137_v28 = vrot.slane %v2424_v24, 4  ;;  %vm775_vm0 = vcmp.eq.s32.totalorder %v687_v7, %v2459_v43 }
 0x186   :  { %2119 = vpow2.f32 %v1206_v1  ;;  %v610_v53 = vadd.f32 %v609_v55, %v608_v35  ;;  %vm779_vm3 = vcmp.eq.s32.totalorder %v687_v7, %v2462_v44  ;;  %vm783_vm5 = vcmp.eq.s32.totalorder %v687_v7, %v2470_v52 }
 0x187   :  { %v640_v0 = vmul.f32 %v3137_v28, %v598_v16  ;;  %v664_v54 = vrot.slane %v641_v50, 3  ;;  %2121 = vpow2.f32 %v1208_v51  ;;  %vm787_vm6 = vcmp.eq.s32.totalorder %v687_v7, %v2476_v58  ;;  %v860_v10 = vpop.permute.xlu1 %859 }
 0x188   :  { %v611_v38 = vrot.slane %v610_v53, 1  ;;  %vm791_vm7 = vcmp.eq.s32.totalorder %v687_v7, %v2481_v61  ;;  %v2669_v13 = vsel %vm767_vm13, 1.0, %v2231_v29  ;;  %v2674_v50 = vsel %vm771_vm14, 1.0, %v2231_v29 }
 0x189   :  { %v661_v4 = vrot.slane %v640_v0, 4  ;;  %2123 = vpow2.f32 %v1210_v36  ;;  %v2680_v8 = vsel %vm775_vm0, 1.0, %v2231_v29  ;;  %v2683_v37 = vsel %vm779_vm3, 1.0, %v2231_v29 }
 0x18a   :  { %v612_v31 = vadd.f32 %v611_v38, %v610_v53  ;;  %vm674_vm8 = vcmask 64512   ;;  %vm764_vm10 = vcmp.eq.s32.totalorder %v2363_v47, %v2452_v40  ;;  %vm768_vm13 = vcmp.eq.s32.totalorder %v2363_v47, %v2456_v42 }
 0x18b   :  { %v663_v35 = vsel %vm662_vm11, %v661_v4, %v660_v20  ;;  %v2693_v20 = vsel %vm783_vm5, 1.0, %v2231_v29  ;;  %vm772_vm14 = vcmp.eq.s32.totalorder %v2363_v47, %v2459_v43  ;;  %vm776_vm0 = vcmp.eq.s32.totalorder %v2363_v47, %v2462_v44  ;;  %v865_v7 = vpop.permute.xlu1 %864 }
 0x18c   :  { %v666_v27 = vsel %vm3135_vm12, %v664_v54, %v663_v35  ;;  %vm780_vm3 = vcmp.eq.s32.totalorder %v2363_v47, %v2470_v52  ;;  %v3138_v56 = vrot.slane %v2424_v24, 6  ;;  %v2706_v42 = vsel %vm787_vm6, 1.0, %v2231_v29 }
 0x18d   :  { %v2711_v41 = vsel %vm791_vm7, 1.0, %v2231_v29  ;;  %vm784_vm5 = vcmp.eq.s32.totalorder %v2363_v47, %v2476_v58  ;;  %vm788_vm12 = vcmp.eq.s32.totalorder %v2363_v47, %v2481_v61  ;;  %v2718_v43 = vsel %vm764_vm10, 1.0, %v2231_v29 }
 0x18e   :  { %v642_v40 = vmul.f32 %v3138_v56, %v612_v31  ;;  %v2721_v44 = vsel %vm768_vm13, 1.0, %v2231_v29  ;;  %v499_v52 = vcombine.high %v2394_v6, %v2394_v6  ;;  %v2116_v1 = vpop.eup %2115  ;;  %v2726_v16 = vsel %vm772_vm14, 1.0, %v2231_v29 }
 0x18f   :  { %v2729_v30 = vsel %vm776_vm0, 1.0, %v2231_v29  ;;  %v2732_v55 = vsel %vm780_vm3, 1.0, %v2231_v29  ;;  %v2118_v36 = vpop.eup %2117  ;;  %v1212_v28 = vsel %vm438_vm1, %v2116_v1, 0.0  ;;  %v873_v0 = vmul.f32 %v2502_v11, %v860_v10 }
 0x190   :  { %v667_v51 = vrot.slane %v642_v40, 2  ;;  %v877_v54 = vmul.f32 %v2511_v15, %v860_v10  ;;  %v881_v6 = vmul.f32 %v2518_v18, %v860_v10  ;;  %v2120_v53 = vpop.eup %2119  ;;  %v1213_v4 = vsel %vm438_vm1, %v2118_v36, 0.0 }
 0x191   :  { %vm905_vm6 = vcmask 57344   ;;  %v2051_v35 = vsel %vm784_vm5, 1.0, %v2231_v29  ;;  %v2055_v11 = vsel %vm788_vm12, 1.0, %v2231_v29  ;;  %v2122_v15 = vpop.eup %2121  ;;  %v1214_v31 = vadd.f32 %v1213_v4, %v1212_v28  ;;  %v870_v4 = vpop.permute.xlu1 %869 }
 0x192   :  { %v2740_v38 = vsel %vm668_vm15, %v667_v51, %v666_v27  ;;  %v2752_v18 = vmul.f32 %v2434_v32, %v2538_v39  ;;  %v885_v27 = vmul.f32 %v2524_v19, %v860_v10  ;;  %v2756_v56 = vrot.slane %v499_v52, %v2388_v2 }
 0x193   :  { %v1215_v40 = vsel %vm438_vm1, %v2120_v53, 0.0  ;;  %v889_v58 = vmul.f32 %v2531_v25, %v860_v10  ;;  %v893_v1 = vmul.f32 %v2546_v45, %v860_v10  ;;  %v897_v61 = vmul.f32 %v2552_v59, %v860_v10  ;;  %v2124_v51 = vpop.eup %2123 }
 0x194   :  { %v1216_v36 = vadd.f32 %v1215_v40, %v1214_v31  ;;  %v901_v28 = vsel %vm674_vm8, %v873_v0, 0.0  ;;  %v915_v32 = vsel %vm674_vm8, %v877_v54, 0.0  ;;  %v928_v39 = vsel %vm674_vm8, %v881_v6, 0.0 }
 0x195   :  { %v1217_v19 = vsel %vm438_vm1, %v2122_v15, 0.0  ;;  %v874_v52 = vmul.f32 %v2558_v63, %v865_v7  ;;  %v878_v53 = vmul.f32 %v2565_v3, %v865_v7  ;;  %v882_v25 = vmul.f32 %v2614_v34, %v865_v7 }
 0x196   :  { %v1218_v45 = vadd.f32 %v1217_v19, %v1216_v36  ;;  %v941_v59 = vsel %vm674_vm8, %v885_v27, 0.0  ;;  %v886_v10 = vmul.f32 %v2622_v26, %v865_v7  ;;  %v890_v0 = vmul.f32 %v2630_v21, %v865_v7 }
 0x197   :  { %v1219_v54 = vsel %vm438_vm1, %v2124_v51, 0.0  ;;  %v954_v6 = vsel %vm674_vm8, %v889_v58, 0.0  ;;  %v894_v15 = vmul.f32 %v2636_v22, %v865_v7  ;;  %v898_v63 = vmul.f32 %v2655_v46, %v865_v7 }
 0x198   :  { %v1220_v31 = vadd.f32 %v1219_v54, %v1218_v45  ;;  %v967_v3 = vsel %vm674_vm8, %v893_v1, 0.0  ;;  %v875_v34 = vmul.f32 %v2669_v13, %v870_v4  ;;  %v879_v40 = vmul.f32 %v2674_v50, %v870_v4 }
 0x199   :  { %v980_v27 = vsel %vm674_vm8, %v897_v61, 0.0  ;;  %v903_v26 = vsel %vm674_vm8, %v874_v52, 0.0  ;;  %v917_v21 = vsel %vm674_vm8, %v878_v53, 0.0  ;;  %v930_v51 = vsel %vm674_vm8, %v882_v25, 0.0 }
 0x19a   :  { %2125 = vlog2.f32 %v1220_v31  ;;  %v943_v22 = vsel %vm674_vm8, %v886_v10, 0.0  ;;  %v956_v46 = vsel %vm674_vm8, %v890_v0, 0.0  ;;  %v883_v7 = vmul.f32 %v2680_v8, %v870_v4 }
 0x19b   :  { %v969_v58 = vsel %vm674_vm8, %v894_v15, 0.0  ;;  %v982_v13 = vsel %vm674_vm8, %v898_v63, 0.0  ;;  %v887_v50 = vmul.f32 %v2683_v37, %v870_v4  ;;  %v891_v1 = vmul.f32 %v2693_v20, %v870_v4  ;;  %v855_v53 = vpop.permute.xlu0 %854 }
 0x19c   :  { %v895_v61 = vmul.f32 %v2706_v42, %v870_v4  ;;  %v899_v36 = vmul.f32 %v2711_v41, %v870_v4  ;;  %v906_v19 = vsel %vm905_vm6, %v875_v34, 0.0  ;;  %v919_v52 = vsel %vm905_vm6, %v879_v40, 0.0 }
 0x19d   :  { %v872_v25 = vmul.f32 %v2718_v43, %v855_v53  ;;  %v876_v8 = vmul.f32 %v2721_v44, %v855_v53  ;;  %v880_v45 = vmul.f32 %v2726_v16, %v855_v53  ;;  %v884_v10 = vmul.f32 %v2729_v30, %v855_v53 }
 0x19e   :  { %v932_v37 = vsel %vm905_vm6, %v883_v7, 0.0  ;;  %v888_v20 = vmul.f32 %v2732_v55, %v855_v53  ;;  %v892_v42 = vmul.f32 %v2051_v35, %v855_v53  ;;  %v896_v0 = vmul.f32 %v2055_v11, %v855_v53 }
 0x19f   :  { %v900_v41 = vsel %vm674_vm8, %v872_v25, 0.0  ;;  %v914_v4 = vsel %vm674_vm8, %v876_v8, 0.0  ;;  %v927_v54 = vsel %vm674_vm8, %v880_v45, 0.0  ;;  %v940_v43 = vsel %vm674_vm8, %v884_v10, 0.0 }
 0x1a0   :  { %v902_v15 = vadd.f32 %v901_v28, %v900_v41  ;;  %v916_v44 = vadd.f32 %v915_v32, %v914_v4  ;;  %v929_v63 = vadd.f32 %v928_v39, %v927_v54  ;;  %v942_v16 = vadd.f32 %v941_v59, %v940_v43  ;;  %v1225_v4 = vld [vmem:[#allocation2 + $0x8] sm:$0x1f] }
 0x1a1   :  { %v945_v30 = vsel %vm905_vm6, %v887_v50, 0.0  ;;  %v953_v31 = vsel %vm674_vm8, %v888_v20, 0.0  ;;  %v966_v55 = vsel %vm674_vm8, %v892_v42, 0.0  ;;  %v979_v35 = vsel %vm674_vm8, %v896_v0, 0.0 }
 0x1a2   :  { %v3139_v11 = vrot.slane %v2371_v49, %v2388_v2  ;;  %v904_v28 = vadd.f32 %v903_v26, %v902_v15  ;;  %v918_v32 = vadd.f32 %v917_v21, %v916_v44  ;;  %v931_v39 = vadd.f32 %v930_v51, %v929_v63 }
 0x1a3   :  { %v944_v59 = vadd.f32 %v943_v22, %v942_v16  ;;  %v958_v40 = vsel %vm905_vm6, %v891_v1, 0.0  ;;  %v955_v7 = vadd.f32 %v954_v6, %v953_v31  ;;  %v968_v50 = vadd.f32 %v967_v3, %v966_v55 }
 0x1a4   :  { %vm2812_vm12 = vcmp.eq.s32.totalorder %v2363_v47, %v3139_v11  ;;  %v981_v53 = vadd.f32 %v980_v27, %v979_v35  ;;  %v2126_v25 = vpop.eup %2125  ;;  %v907_v8 = vadd.f32 %v906_v19, %v904_v28  ;;  %v920_v45 = vadd.f32 %v919_v52, %v918_v32 }
 0x1a5   :  { %v933_v10 = vadd.f32 %v932_v37, %v931_v39  ;;  %v946_v20 = vadd.f32 %v945_v30, %v944_v59  ;;  %v1222_v49 = vmul.f32 0.6931472, %v2126_v25  ;;  %v971_v42 = vsel %vm905_vm6, %v895_v61, 0.0 }
 0x1a6   :  { %v957_v0 = vadd.f32 %v956_v46, %v955_v7  ;;  %v970_v41 = vadd.f32 %v969_v58, %v968_v50  ;;  %v908_v26 = vrot.slane %v907_v8, 4  ;;  %v921_v21 = vrot.slane %v920_v45, 4 }
 0x1a7   :  { %v934_v51 = vrot.slane %v933_v10, 4  ;;  %v947_v22 = vrot.slane %v946_v20, 4  ;;  %v1223_v1 = vadd.f32 %v1222_v49, %v2624_v12  ;;  %v983_v27 = vadd.f32 %v982_v13, %v981_v53 }
 0x1a8   :  { %v959_v6 = vadd.f32 %v958_v40, %v957_v0  ;;  %v972_v3 = vadd.f32 %v971_v42, %v970_v41  ;;  %v909_v54 = vadd.f32 %v908_v26, %v907_v8  ;;  %v922_v19 = vadd.f32 %v921_v21, %v920_v45 }
 0x1a9   :  { %v935_v52 = vadd.f32 %v934_v51, %v933_v10  ;;  %v948_v37 = vadd.f32 %v947_v22, %v946_v20  ;;  %v1226_v43 = vadd.f32 %v1225_v4, %v1223_v1  ;;  %v984_v15 = vsel %vm905_vm6, %v899_v36, 0.0 }
 0x1aa   :  { %v960_v61 = vrot.slane %v959_v6, 4  ;;  %v973_v46 = vrot.slane %v972_v3, 4  ;;  %v910_v58 = vrot.slane %v909_v54, 2  ;;  %v923_v44 = vrot.slane %v922_v19, 2 }
 0x1ab   :  { %v936_v63 = vrot.slane %v935_v52, 2  ;;  %v949_v16 = vrot.slane %v948_v37, 2  ;;  %v1232_v12 = vmul.f32 %v1231_v60, %v1226_v43  ;;  %v985_v13 = vadd.f32 %v984_v15, %v983_v27 }
 0x1ac   :  { %v961_v30 = vadd.f32 %v960_v61, %v959_v6  ;;  %v974_v31 = vadd.f32 %v973_v46, %v972_v3  ;;  %v911_v55 = vadd.f32 %v910_v58, %v909_v54  ;;  %v924_v35 = vadd.f32 %v923_v44, %v922_v19 }
 0x1ad   :  { %v937_v11 = vadd.f32 %v936_v63, %v935_v52  ;;  %v950_v28 = vadd.f32 %v949_v16, %v948_v37  ;;  %v2826_v36 = vsel %vm2812_vm12, 1.0, %v2231_v29  ;;  %v2829_v32 = vadd.f32 %v2752_v18, %v1232_v12 }
 0x1ae   :  { %v962_v39 = vrot.slane %v961_v30, 2  ;;  %v975_v59 = vrot.slane %v974_v31, 2  ;;  %v912_v40 = vrot.slane %v911_v55, 1  ;;  %v925_v9 = vrot.slane %v924_v35, 1 }
 0x1af   :  { %v938_v60 = vrot.slane %v937_v11, 1  ;;  %v951_v7 = vrot.slane %v950_v28, 1  ;;  %v1241_v50 = vcombine.high %v2829_v32, %v2829_v32  ;;  %v1248_v53 = vrot.slane %v2829_v32, %v2366_v48 }
 0x1b0   :  { %v963_v25 = vadd.f32 %v962_v39, %v961_v30  ;;  %vm539_vm7 = vcmp.eq.s32.totalorder %v2363_v47, %v2756_v56  ;;  %v913_v34 = vadd.f32 %v912_v40, %v911_v55  ;;  %v926_v8 = vadd.f32 %v925_v9, %v924_v35 }
 0x1b1   :  { %v939_v18 = vadd.f32 %v938_v60, %v937_v11  ;;  %v986_v45 = vrot.slane %v985_v13, 4  ;;  %v1255_v10 = vrot.slane %v1241_v50, %v2366_v48  ;;  %v1256_v20 = vcombine.high %v1248_v53, %v1248_v53 }
 0x1b2   :  { %v1263_v49 = vrot.slane %v1248_v53, %v2366_v48  ;;  %v964_v42 = vrot.slane %v963_v25, 1  ;;  %v952_v0 = vadd.f32 %v951_v7, %v950_v28  ;;  %v976_v41 = vadd.f32 %v975_v59, %v974_v31 }
 0x1b3   :  { %v3142_v4 = vrot.slane %v2424_v24, 2  ;;  %v3143_v21 = vrot.slane %v2424_v24, 3  ;;  %v1270_v22 = vrot.slane %v1255_v10, %v2366_v48  ;;  %v1277_v1 = vrot.slane %v1256_v20, %v2366_v48 }
 0x1b4   :  { %v1278_v6 = vcombine.high %v1263_v49, %v1263_v49  ;;  %v1283_v3 = vrot.slane %v1263_v49, %v2388_v2  ;;  %v965_v27 = vadd.f32 %v964_v42, %v963_v25  ;;  %v977_v54 = vrot.slane %v976_v41, 1 }
 0x1b5   :  { %v993_v26 = vmul.f32 %v926_v8, %v3142_v4  ;;  %v994_v51 = vmul.f32 %v939_v18, %v3143_v21  ;;  %v1279_v37 = vcombine.high %v1277_v1, %v1277_v1  ;;  %v1287_v43 = vrot.slane %v1277_v1, %v2388_v2 }
 0x1b6   :  { %v1291_v15 = vrot.slane %v1278_v6, %v2388_v2  ;;  %v1299_v61 = vrot.slane %v1270_v22, %v2388_v2  ;;  %v1305_v46 = vadd.f32 %v1283_v3, %v2406_v14  ;;  %v987_v58 = vadd.f32 %v986_v45, %v985_v13 }
 0x1b7   :  { %v1006_v19 = vrot.slane %v993_v26, 7  ;;  %v1008_v52 = vrot.slane %v994_v51, 6  ;;  %v978_v44 = vadd.f32 %v977_v54, %v976_v41  ;;  %v3144_v63 = vrot.slane %v2424_v24, 4 }
 0x1b8   :  { %v1295_v12 = vrot.slane %v1279_v37, %v2388_v2  ;;  %v1306_v30 = vadd.f32 %v1287_v43, %v2391_v5  ;;  %v1307_v31 = vadd.f32 %v1291_v15, %v2437_v33  ;;  %v1309_v55 = vadd.f32 %v1299_v61, %v2380_v57 }
 0x1b9   :  { %v995_v16 = vmul.f32 %v952_v0, %v3144_v63  ;;  %v1310_v35 = vsel %vm438_vm1, %v1305_v46, -inf  ;;  %v3145_v11 = vrot.slane %v2424_v24, 1  ;;  %v2030_v13 = vsel %vm539_vm7, 1.0, %v2231_v29 }
 0x1ba   :  { %v988_v39 = vrot.slane %v987_v58, 2  ;;  %v1308_v59 = vadd.f32 %v1295_v12, %v2419_v23  ;;  %v1314_v40 = vsel %vm438_vm1, %v1309_v55, -inf  ;;  %v3146_v9 = vrot.slane %v2424_v24, 5  ;;  %v422_v45 = vpop.trf.xlu0 }
 0x1bb   :  { %v992_v28 = vmul.f32 %v913_v34, %v3145_v11  ;;  %v3147_v7 = vrot.slane %v2424_v24, 6  ;;  %v1311_v53 = vsel %vm438_vm1, %v1306_v30, -inf  ;;  %v1315_v25 = vmax.f32 %v1310_v35, %v1314_v40  ;;  %446 = vst.msk [vmem:[#allocation2 + $0x38] sm:$0x1f] %vm438_vm1, %v422_v45 }
 0x1bc   :  { %v996_v60 = vmul.f32 %v965_v27, %v3146_v9  ;;  %v989_v34 = vadd.f32 %v988_v39, %v987_v58  ;;  %v1312_v56 = vsel %vm438_vm1, %v1307_v31, -inf  ;;  %v1313_v18 = vsel %vm438_vm1, %v1308_v59, -inf }
 0x1bd   :  { %v997_v50 = vmul.f32 %v978_v44, %v3147_v7  ;;  %v1007_v8 = vsel %vm653_vm2, %v1006_v19, %v992_v28  ;;  %v1010_v20 = vrot.slane %v995_v16, 5  ;;  %v1316_v49 = vmax.f32 %v1315_v25, %v1311_v53 }
 0x1be   :  { %v1009_v10 = vsel %vm656_vm4, %v1008_v52, %v1007_v8  ;;  %v1317_v42 = vmax.f32 %v1312_v56, %v1313_v18  ;;  %v990_v0 = vrot.slane %v989_v34, 1  ;;  %v563_v41 = vmul.f32 %v2030_v13, %v422_v45 }
 0x1bf   :  { %v627_v4 = vrot.slane %v2424_v24, 7  ;;  %v1011_v26 = vsel %vm659_vm9, %v1010_v20, %v1009_v10  ;;  %v1012_v21 = vrot.slane %v996_v60, 4  ;;  %v1040_v6 = vmul.f32 %v2826_v36, %v2385_v62 }
 0x1c0   :  { %v2877_v51 = vmax.f32 %v1316_v49, %v1317_v42  ;;  %v991_v22 = vadd.f32 %v990_v0, %v989_v34  ;;  %v613_v1 = vsel %vm438_vm1, %v563_v41, 0.0  ;;  %v1014_v54 = vrot.slane %v997_v50, 3 }
 0x1c1   :  { %v614_v3 = vrot.slane %v613_v1, 4  ;;  %v1013_v27 = vsel %vm662_vm11, %v1012_v21, %v1011_v26  ;;  %vm3148_vm2 = vcmask 1045509   ;;  %vm1019_vm4 = vcmask 63488  }
 0x1c2   :  { %v1319_v19 = vsub.f32 %v1305_v46, %v2877_v51  ;;  %v1320_v52 = vsub.f32 %v1306_v30, %v2877_v51  ;;  %v1321_v24 = vsub.f32 %v1307_v31, %v2877_v51  ;;  %v1322_v37 = vsub.f32 %v1308_v59, %v2877_v51 }
 0x1c3   :  { %v1323_v43 = vsub.f32 %v1309_v55, %v2877_v51  ;;  %v998_v15 = vmul.f32 %v991_v22, %v627_v4  ;;  %v615_v61 = vadd.f32 %v614_v3, %v613_v1  ;;  %v1015_v62 = vsel %vm3148_vm2, %v1014_v54, %v1013_v27 }
 0x1c4   :  { %v1324_v58 = vmul.f32 1.442695, %v1319_v19  ;;  %v1326_v44 = vmul.f32 1.442695, %v1320_v52  ;;  %v1328_v63 = vmul.f32 1.442695, %v1321_v24 }
 0x1c5   :  { %v1330_v36 = vmul.f32 1.442695, %v1322_v37  ;;  %v1016_v16 = vrot.slane %v998_v15, 2  ;;  %v616_v12 = vrot.slane %v615_v61, 2  ;;  %v1041_v46 = vsel %vm438_vm1, %v1040_v6, 0.0 }
 0x1c6   :  { %2127 = vpow2.f32 %v1324_v58  ;;  %v1332_v30 = vmul.f32 1.442695, %v1323_v43  ;;  %v1042_v11 = vrot.slane %v1041_v46, 4  ;;  %vm671_vm9 = vcmask 1047559  }
 0x1c7   :  { %2129 = vpow2.f32 %v1326_v44  ;;  %v617_v31 = vadd.f32 %v616_v12, %v615_v61  ;;  %v1017_v35 = vsel %vm668_vm15, %v1016_v16, %v1015_v62  ;;  %v1349_v61 = vld [vmem:[%s3129_s7 + $0x2] sm:$0x1] }
 0x1c8   :  { %2131 = vpow2.f32 %v1328_v63  ;;  %v1020_v55 = vsel %vm1019_vm4, %v1017_v35, 0.0  ;;  %v1043_v59 = vadd.f32 %v1042_v11, %v1041_v46  ;;  %v1355_v44 = vsub.f32 1.0, %v1349_v61 }
 0x1c9   :  { %2133 = vpow2.f32 %v1330_v36  ;;  %v618_v28 = vrot.slane %v617_v31, 1  ;;  %v1021_v39 = vrot.slane %v1020_v55, 4  ;;  %v1347_v36 = vld [vmem:[#allocation2 + $0x10] sm:$0x1f]  ;;  %v1353_v12 = vrot.slane %v1349_v61, %v2388_v2 }
 0x1ca   :  { %2135 = vpow2.f32 %v1332_v30  ;;  %v1044_v53 = vrot.slane %v1043_v59, 2  ;;  %v1359_v46 = vrot.slane %v1355_v44, %v2388_v2 }
 0x1cb   :  { %v619_v13 = vadd.f32 %v618_v28, %v617_v31  ;;  %v1022_v60 = vadd.f32 %v1021_v39, %v1020_v55 }
 0x1cc   :  { %v1045_v41 = vadd.f32 %v1044_v53, %v1043_v59  ;;  %v1360_v31 = vmul.f32 %v1359_v46, %v2829_v32 }
 0x1cd   :  { %v643_v40 = vmul.f32 %v627_v4, %v619_v13  ;;  %v1023_v49 = vrot.slane %v1022_v60, 2 }
 0x1ce   :  { %v1046_v3 = vrot.slane %v1045_v41, 1 }
 0x1cf   :  { %v670_v9 = vrot.slane %v643_v40, 1 }
 0x1d0   :  { %v2128_v7 = vpop.eup %2127  ;;  %v1047_v24 = vadd.f32 %v1046_v3, %v1045_v41 }
 0x1d1   :  { %v2130_v50 = vpop.eup %2129  ;;  %v1334_v25 = vsel %vm438_vm1, %v2128_v7, 0.0  ;;  %v672_v34 = vsel %vm671_vm9, %v670_v9, %v2740_v38  ;;  %v1024_v38 = vadd.f32 %v1023_v49, %v1022_v60 }
 0x1d2   :  { %v2132_v8 = vpop.eup %2131  ;;  %v1335_v56 = vsel %vm438_vm1, %v2130_v50, 0.0  ;;  %v675_v18 = vsel %vm674_vm8, %v672_v34, 0.0 }
 0x1d3   :  { %v2134_v45 = vpop.eup %2133  ;;  %v1336_v10 = vadd.f32 %v1335_v56, %v1334_v25  ;;  %v676_v20 = vrot.slane %v675_v18, 4  ;;  %v1337_v42 = vsel %vm438_vm1, %v2132_v8, 0.0  ;;  %v1025_v52 = vrot.slane %v1024_v38, 1 }
 0x1d4   :  { %v2136_v0 = vpop.eup %2135  ;;  %v1339_v21 = vsel %vm438_vm1, %v2134_v45, 0.0 }
 0x1d5   :  { %v1338_v4 = vadd.f32 %v1337_v42, %v1336_v10  ;;  %v677_v26 = vadd.f32 %v676_v20, %v675_v18  ;;  %v1341_v6 = vsel %vm438_vm1, %v2136_v0, 0.0  ;;  %v1026_v43 = vadd.f32 %v1025_v52, %v1024_v38 }
 0x1d7   :  { %v1340_v22 = vadd.f32 %v1339_v21, %v1338_v4  ;;  %v678_v1 = vrot.slane %v677_v26, 2 }
 0x1d9   :  { %v1342_v27 = vadd.f32 %v1341_v6, %v1340_v22  ;;  %v679_v54 = vadd.f32 %v678_v1, %v677_v26 }
 0x1db   :  { %2137 = vlog2.f32 %v1342_v27  ;;  %v680_v19 = vrot.slane %v679_v54, 1 }
 0x1dd   :  { %v681_v37 = vadd.f32 %v680_v19, %v679_v54 }
 0x1df   :  { %v1083_v15 = vadd.f32 %v1047_v24, %v681_v37 }
 0x1e1   :  { %v2901_v58 = vadd.f32 %v1083_v15, %v1026_v43 }
 0x1e5   :  { %v2138_v63 = vpop.eup %2137 }
 0x1e6   :  { %v1344_v62 = vmul.f32 0.6931472, %v2138_v63 }
 0x1e8   :  { %v1345_v16 = vadd.f32 %v1344_v62, %v2877_v51 }
 0x1ea   :  { %v1348_v30 = vadd.f32 %v1347_v36, %v1345_v16 }
 0x1ec   :  { %v1354_v35 = vmul.f32 %v1353_v12, %v1348_v30 }
 0x1ee   :  { %v2907_v55 = vadd.f32 %v1360_v31, %v1354_v35 }
 0x1f0   :  { %v1363_v11 = vcombine.high %v2907_v55, %v2907_v55  ;;  %v1370_v28 = vrot.slane %v2907_v55, %v2366_v48 }
 0x1f2   :  { %v1377_v13 = vrot.slane %v1363_v11, %v2366_v48  ;;  %v1378_v39 = vcombine.high %v1370_v28, %v1370_v28  ;;  %v1385_v51 = vrot.slane %v1370_v28, %v2366_v48  ;;  %v1471_v11 = vld [vmem:[%s3129_s7 + $0x3] sm:$0x1] }
 0x1f3   :  { %v1477_v28 = vsub.f32 1.0, %v1471_v11 }
 0x1f4   :  { %v1392_v59 = vrot.slane %v1377_v13, %v2366_v48  ;;  %v1399_v40 = vrot.slane %v1378_v39, %v2366_v48  ;;  %v1400_v9 = vcombine.high %v1385_v51, %v1385_v51  ;;  %v1405_v32 = vrot.slane %v1385_v51, %v2388_v2  ;;  %v1469_v51 = vld [vmem:[#allocation2 + $0x18] sm:$0x1f] }
 0x1f6   :  { %v1401_v60 = vcombine.high %v1399_v40, %v1399_v40  ;;  %v1409_v7 = vrot.slane %v1399_v40, %v2388_v2  ;;  %v1413_v50 = vrot.slane %v1400_v9, %v2388_v2  ;;  %v1421_v53 = vrot.slane %v1392_v59, %v2388_v2 }
 0x1f7   :  { %v1427_v25 = vadd.f32 %v1405_v32, %v2406_v14  ;;  %v1475_v40 = vrot.slane %v1471_v11, %v2388_v2  ;;  %v1481_v9 = vrot.slane %v1477_v28, %v2388_v2 }
 0x1f8   :  { %v1417_v34 = vrot.slane %v1401_v60, %v2388_v2  ;;  %v1428_v8 = vadd.f32 %v1409_v7, %v2391_v5  ;;  %v1429_v56 = vadd.f32 %v1413_v50, %v2437_v33  ;;  %v1431_v18 = vadd.f32 %v1421_v53, %v2380_v57 }
 0x1f9   :  { %v1432_v10 = vsel %vm438_vm1, %v1427_v25, -inf  ;;  %v1482_v60 = vmul.f32 %v1481_v9, %v2907_v55 }
 0x1fa   :  { %v1430_v45 = vadd.f32 %v1417_v34, %v2419_v23  ;;  %v1436_v20 = vsel %vm438_vm1, %v1431_v18, -inf  ;;  %v1433_v42 = vsel %vm438_vm1, %v1428_v8, -inf  ;;  %v1434_v0 = vsel %vm438_vm1, %v1429_v56, -inf }
 0x1fb   :  { %v1437_v49 = vmax.f32 %v1432_v10, %v1436_v20 }
 0x1fc   :  { %v1435_v41 = vsel %vm438_vm1, %v1430_v45, -inf }
 0x1fd   :  { %v1438_v4 = vmax.f32 %v1437_v49, %v1433_v42  ;;  %v1439_v26 = vmax.f32 %v1434_v0, %v1435_v41 }
 0x1ff   :  { %v1440_v21 = vmax.f32 %v1438_v4, %v1439_v26 }
 0x201   :  { %v1441_v22 = vsub.f32 %v1427_v25, %v1440_v21  ;;  %v1442_v1 = vsub.f32 %v1428_v8, %v1440_v21  ;;  %v1443_v38 = vsub.f32 %v1429_v56, %v1440_v21  ;;  %v1444_v6 = vsub.f32 %v1430_v45, %v1440_v21 }
 0x202   :  { %v1445_v3 = vsub.f32 %v1431_v18, %v1440_v21 }
 0x203   :  { %v1446_v27 = vmul.f32 1.442695, %v1441_v22  ;;  %v1448_v54 = vmul.f32 1.442695, %v1442_v1  ;;  %v1450_v19 = vmul.f32 1.442695, %v1443_v38 }
 0x204   :  { %v1452_v52 = vmul.f32 1.442695, %v1444_v6  ;;  %v1454_v24 = vmul.f32 1.442695, %v1445_v3 }
 0x205   :  { %2139 = vpow2.f32 %v1446_v27 }
 0x206   :  { %2141 = vpow2.f32 %v1448_v54 }
 0x207   :  { %2143 = vpow2.f32 %v1450_v19 }
 0x208   :  { %2145 = vpow2.f32 %v1452_v52 }
 0x209   :  { %2147 = vpow2.f32 %v1454_v24 }
 0x20f   :  { %v2140_v37 = vpop.eup %2139 }
 0x210   :  { %v2142_v43 = vpop.eup %2141  ;;  %v1456_v15 = vsel %vm438_vm1, %v2140_v37, 0.0 }
 0x211   :  { %v2144_v61 = vpop.eup %2143  ;;  %v1457_v44 = vsel %vm438_vm1, %v2142_v43, 0.0 }
 0x212   :  { %v2146_v63 = vpop.eup %2145  ;;  %v1458_v62 = vadd.f32 %v1457_v44, %v1456_v15  ;;  %v1459_v36 = vsel %vm438_vm1, %v2144_v61, 0.0 }
 0x213   :  { %v2148_v16 = vpop.eup %2147  ;;  %v1461_v46 = vsel %vm438_vm1, %v2146_v63, 0.0 }
 0x214   :  { %v1460_v12 = vadd.f32 %v1459_v36, %v1458_v62  ;;  %v1463_v31 = vsel %vm438_vm1, %v2148_v16, 0.0 }
 0x216   :  { %v1462_v30 = vadd.f32 %v1461_v46, %v1460_v12 }
 0x218   :  { %v1464_v35 = vadd.f32 %v1463_v31, %v1462_v30 }
 0x21a   :  { %2149 = vlog2.f32 %v1464_v35 }
 0x224   :  { %v2150_v13 = vpop.eup %2149 }
 0x225   :  { %v1466_v39 = vmul.f32 0.6931472, %v2150_v13 }
 0x227   :  { %v1467_v59 = vadd.f32 %v1466_v39, %v1440_v21 }
 0x229   :  { %v1470_v32 = vadd.f32 %v1469_v51, %v1467_v59 }
 0x22b   :  { %v1476_v7 = vmul.f32 %v1475_v40, %v1470_v32 }
 0x22d   :  { %v2943_v50 = vadd.f32 %v1482_v60, %v1476_v7 }
 0x22f   :  { %v1485_v53 = vcombine.high %v2943_v50, %v2943_v50  ;;  %v1492_v25 = vrot.slane %v2943_v50, %v2366_v48 }
 0x231   :  { %v1499_v34 = vrot.slane %v1485_v53, %v2366_v48  ;;  %v1500_v8 = vcombine.high %v1492_v25, %v1492_v25  ;;  %v1507_v56 = vrot.slane %v1492_v25, %v2366_v48  ;;  %v1593_v53 = vld [vmem:[%s3129_s7 + $0x4] sm:$0x1] }
 0x232   :  { %v1599_v25 = vsub.f32 1.0, %v1593_v53 }
 0x233   :  { %v1514_v18 = vrot.slane %v1499_v34, %v2366_v48  ;;  %v1521_v45 = vrot.slane %v1500_v8, %v2366_v48  ;;  %v1522_v10 = vcombine.high %v1507_v56, %v1507_v56  ;;  %v1527_v55 = vrot.slane %v1507_v56, %v2388_v2  ;;  %v1591_v56 = vld [vmem:[#allocation2 + $0x20] sm:$0x1f] }
 0x235   :  { %v1523_v20 = vcombine.high %v1521_v45, %v1521_v45  ;;  %v1531_v49 = vrot.slane %v1521_v45, %v2388_v2  ;;  %v1535_v42 = vrot.slane %v1522_v10, %v2388_v2  ;;  %v1543_v0 = vrot.slane %v1514_v18, %v2388_v2 }
 0x236   :  { %v1549_v41 = vadd.f32 %v1527_v55, %v2406_v14  ;;  %v1597_v45 = vrot.slane %v1593_v53, %v2388_v2  ;;  %v1603_v10 = vrot.slane %v1599_v25, %v2388_v2 }
 0x237   :  { %v1539_v4 = vrot.slane %v1523_v20, %v2388_v2  ;;  %v1550_v26 = vadd.f32 %v1531_v49, %v2391_v5  ;;  %v1551_v21 = vadd.f32 %v1535_v42, %v2437_v33  ;;  %v1553_v22 = vadd.f32 %v1543_v0, %v2380_v57 }
 0x238   :  { %v1554_v38 = vsel %vm438_vm1, %v1549_v41, -inf  ;;  %v1604_v49 = vmul.f32 %v1603_v10, %v2943_v50 }
 0x239   :  { %v1552_v1 = vadd.f32 %v1539_v4, %v2419_v23  ;;  %v1558_v6 = vsel %vm438_vm1, %v1553_v22, -inf  ;;  %v1555_v27 = vsel %vm438_vm1, %v1550_v26, -inf  ;;  %v1556_v54 = vsel %vm438_vm1, %v1551_v21, -inf }
 0x23a   :  { %v1559_v3 = vmax.f32 %v1554_v38, %v1558_v6 }
 0x23b   :  { %v1557_v19 = vsel %vm438_vm1, %v1552_v1, -inf }
 0x23c   :  { %v1560_v52 = vmax.f32 %v1559_v3, %v1555_v27  ;;  %v1561_v24 = vmax.f32 %v1556_v54, %v1557_v19 }
 0x23e   :  { %v1562_v37 = vmax.f32 %v1560_v52, %v1561_v24 }
 0x240   :  { %v1563_v43 = vsub.f32 %v1549_v41, %v1562_v37  ;;  %v1564_v15 = vsub.f32 %v1550_v26, %v1562_v37  ;;  %v1565_v61 = vsub.f32 %v1551_v21, %v1562_v37  ;;  %v1566_v44 = vsub.f32 %v1552_v1, %v1562_v37 }
 0x241   :  { %v1567_v63 = vsub.f32 %v1553_v22, %v1562_v37 }
 0x242   :  { %v1568_v62 = vmul.f32 1.442695, %v1563_v43  ;;  %v1570_v36 = vmul.f32 1.442695, %v1564_v15  ;;  %v1572_v16 = vmul.f32 1.442695, %v1565_v61 }
 0x243   :  { %v1574_v12 = vmul.f32 1.442695, %v1566_v44  ;;  %v1576_v46 = vmul.f32 1.442695, %v1567_v63 }
 0x244   :  { %2151 = vpow2.f32 %v1568_v62 }
 0x245   :  { %2153 = vpow2.f32 %v1570_v36 }
 0x246   :  { %2155 = vpow2.f32 %v1572_v16 }
 0x247   :  { %2157 = vpow2.f32 %v1574_v12 }
 0x248   :  { %2159 = vpow2.f32 %v1576_v46 }
 0x24e   :  { %v2152_v30 = vpop.eup %2151 }
 0x24f   :  { %v2154_v31 = vpop.eup %2153  ;;  %v1578_v35 = vsel %vm438_vm1, %v2152_v30, 0.0 }
 0x250   :  { %v2156_v11 = vpop.eup %2155  ;;  %v1579_v28 = vsel %vm438_vm1, %v2154_v31, 0.0 }
 0x251   :  { %v2158_v13 = vpop.eup %2157  ;;  %v1580_v39 = vadd.f32 %v1579_v28, %v1578_v35  ;;  %v1581_v51 = vsel %vm438_vm1, %v2156_v11, 0.0 }
 0x252   :  { %v2160_v59 = vpop.eup %2159  ;;  %v1583_v9 = vsel %vm438_vm1, %v2158_v13, 0.0 }
 0x253   :  { %v1582_v40 = vadd.f32 %v1581_v51, %v1580_v39  ;;  %v1585_v60 = vsel %vm438_vm1, %v2160_v59, 0.0 }
 0x255   :  { %v1584_v32 = vadd.f32 %v1583_v9, %v1582_v40 }
 0x257   :  { %v1586_v7 = vadd.f32 %v1585_v60, %v1584_v32 }
 0x259   :  { %2161 = vlog2.f32 %v1586_v7 }
 0x263   :  { %v2162_v34 = vpop.eup %2161 }
 0x264   :  { %v1588_v8 = vmul.f32 0.6931472, %v2162_v34 }
 0x266   :  { %v1589_v18 = vadd.f32 %v1588_v8, %v1562_v37 }
 0x268   :  { %v1592_v55 = vadd.f32 %v1591_v56, %v1589_v18 }
 0x26a   :  { %v1598_v20 = vmul.f32 %v1597_v45, %v1592_v55 }
 0x26c   :  { %v2979_v42 = vadd.f32 %v1604_v49, %v1598_v20 }
 0x26e   :  { %v1607_v0 = vcombine.high %v2979_v42, %v2979_v42  ;;  %v1614_v41 = vrot.slane %v2979_v42, %v2366_v48 }
 0x270   :  { %v1621_v4 = vrot.slane %v1607_v0, %v2366_v48  ;;  %v1622_v26 = vcombine.high %v1614_v41, %v1614_v41  ;;  %v1629_v21 = vrot.slane %v1614_v41, %v2366_v48  ;;  %v1715_v0 = vld [vmem:[%s3129_s7 + $0x5] sm:$0x1] }
 0x271   :  { %v1721_v41 = vsub.f32 1.0, %v1715_v0 }
 0x272   :  { %v1636_v22 = vrot.slane %v1621_v4, %v2366_v48  ;;  %v1643_v1 = vrot.slane %v1622_v26, %v2366_v48  ;;  %v1644_v38 = vcombine.high %v1629_v21, %v1629_v21  ;;  %v1649_v50 = vrot.slane %v1629_v21, %v2388_v2  ;;  %v1713_v21 = vld [vmem:[#allocation2 + $0x28] sm:$0x1f] }
 0x274   :  { %v1645_v6 = vcombine.high %v1643_v1, %v1643_v1  ;;  %v1653_v3 = vrot.slane %v1643_v1, %v2388_v2  ;;  %v1657_v27 = vrot.slane %v1644_v38, %v2388_v2  ;;  %v1665_v54 = vrot.slane %v1636_v22, %v2388_v2 }
 0x275   :  { %v1671_v19 = vadd.f32 %v1649_v50, %v2406_v14  ;;  %v1719_v1 = vrot.slane %v1715_v0, %v2388_v2  ;;  %v1725_v38 = vrot.slane %v1721_v41, %v2388_v2 }
 0x276   :  { %v1661_v52 = vrot.slane %v1645_v6, %v2388_v2  ;;  %v1672_v24 = vadd.f32 %v1653_v3, %v2391_v5  ;;  %v1673_v37 = vadd.f32 %v1657_v27, %v2437_v33  ;;  %v1675_v43 = vadd.f32 %v1665_v54, %v2380_v57 }
 0x277   :  { %v1676_v61 = vsel %vm438_vm1, %v1671_v19, -inf  ;;  %v1726_v3 = vmul.f32 %v1725_v38, %v2979_v42 }
 0x278   :  { %v1674_v15 = vadd.f32 %v1661_v52, %v2419_v23  ;;  %v1680_v44 = vsel %vm438_vm1, %v1675_v43, -inf  ;;  %v1677_v62 = vsel %vm438_vm1, %v1672_v24, -inf  ;;  %v1678_v36 = vsel %vm438_vm1, %v1673_v37, -inf }
 0x279   :  { %v1681_v63 = vmax.f32 %v1676_v61, %v1680_v44 }
 0x27a   :  { %v1679_v16 = vsel %vm438_vm1, %v1674_v15, -inf }
 0x27b   :  { %v1682_v12 = vmax.f32 %v1681_v63, %v1677_v62  ;;  %v1683_v46 = vmax.f32 %v1678_v36, %v1679_v16 }
 0x27d   :  { %v1684_v30 = vmax.f32 %v1682_v12, %v1683_v46 }
 0x27f   :  { %v1685_v31 = vsub.f32 %v1671_v19, %v1684_v30  ;;  %v1686_v35 = vsub.f32 %v1672_v24, %v1684_v30  ;;  %v1687_v11 = vsub.f32 %v1673_v37, %v1684_v30  ;;  %v1688_v28 = vsub.f32 %v1674_v15, %v1684_v30 }
 0x280   :  { %v1689_v13 = vsub.f32 %v1675_v43, %v1684_v30 }
 0x281   :  { %v1690_v39 = vmul.f32 1.442695, %v1685_v31  ;;  %v1692_v51 = vmul.f32 1.442695, %v1686_v35  ;;  %v1694_v59 = vmul.f32 1.442695, %v1687_v11 }
 0x282   :  { %v1696_v40 = vmul.f32 1.442695, %v1688_v28  ;;  %v1698_v9 = vmul.f32 1.442695, %v1689_v13 }
 0x283   :  { %2163 = vpow2.f32 %v1690_v39 }
 0x284   :  { %2165 = vpow2.f32 %v1692_v51 }
 0x285   :  { %2167 = vpow2.f32 %v1694_v59 }
 0x286   :  { %2169 = vpow2.f32 %v1696_v40 }
 0x287   :  { %2171 = vpow2.f32 %v1698_v9 }
 0x28d   :  { %v2164_v32 = vpop.eup %2163 }
 0x28e   :  { %v2166_v60 = vpop.eup %2165  ;;  %v1700_v7 = vsel %vm438_vm1, %v2164_v32, 0.0 }
 0x28f   :  { %v2168_v53 = vpop.eup %2167  ;;  %v1701_v25 = vsel %vm438_vm1, %v2166_v60, 0.0 }
 0x290   :  { %v2170_v34 = vpop.eup %2169  ;;  %v1702_v8 = vadd.f32 %v1701_v25, %v1700_v7  ;;  %v1703_v56 = vsel %vm438_vm1, %v2168_v53, 0.0 }
 0x291   :  { %v2172_v18 = vpop.eup %2171  ;;  %v1705_v10 = vsel %vm438_vm1, %v2170_v34, 0.0 }
 0x292   :  { %v1704_v45 = vadd.f32 %v1703_v56, %v1702_v8  ;;  %v1707_v20 = vsel %vm438_vm1, %v2172_v18, 0.0 }
 0x294   :  { %v1706_v55 = vadd.f32 %v1705_v10, %v1704_v45 }
 0x296   :  { %v1708_v49 = vadd.f32 %v1707_v20, %v1706_v55 }
 0x298   :  { %2173 = vlog2.f32 %v1708_v49 }
 0x2a2   :  { %v2174_v4 = vpop.eup %2173 }
 0x2a3   :  { %v1710_v26 = vmul.f32 0.6931472, %v2174_v4 }
 0x2a5   :  { %v1711_v22 = vadd.f32 %v1710_v26, %v1684_v30 }
 0x2a7   :  { %v1714_v50 = vadd.f32 %v1713_v21, %v1711_v22 }
 0x2a9   :  { %v1720_v6 = vmul.f32 %v1719_v1, %v1714_v50 }
 0x2ab   :  { %v3015_v27 = vadd.f32 %v1726_v3, %v1720_v6 }
 0x2ad   :  { %v1729_v54 = vcombine.high %v3015_v27, %v3015_v27  ;;  %v1736_v19 = vrot.slane %v3015_v27, %v2366_v48 }
 0x2af   :  { %v1743_v52 = vrot.slane %v1729_v54, %v2366_v48  ;;  %v1744_v24 = vcombine.high %v1736_v19, %v1736_v19  ;;  %v1751_v37 = vrot.slane %v1736_v19, %v2366_v48  ;;  %v1837_v54 = vld [vmem:[%s3129_s7 + $0x6] sm:$0x1] }
 0x2b0   :  { %v1843_v19 = vsub.f32 1.0, %v1837_v54 }
 0x2b1   :  { %v1758_v43 = vrot.slane %v1743_v52, %v2366_v48  ;;  %v1765_v15 = vrot.slane %v1744_v24, %v2366_v48  ;;  %v1766_v61 = vcombine.high %v1751_v37, %v1751_v37  ;;  %v1771_v42 = vrot.slane %v1751_v37, %v2388_v2  ;;  %v1835_v37 = vld [vmem:[#allocation2 + $0x30] sm:$0x1f] }
 0x2b3   :  { %v1767_v44 = vcombine.high %v1765_v15, %v1765_v15  ;;  %v1775_v63 = vrot.slane %v1765_v15, %v2388_v2  ;;  %v1779_v62 = vrot.slane %v1766_v61, %v2388_v2  ;;  %v1787_v36 = vrot.slane %v1758_v43, %v2388_v2 }
 0x2b4   :  { %v1793_v16 = vadd.f32 %v1771_v42, %v2406_v14  ;;  %v1841_v15 = vrot.slane %v1837_v54, %v2388_v2  ;;  %v1847_v61 = vrot.slane %v1843_v19, %v2388_v2 }
 0x2b5   :  { %v1783_v12 = vrot.slane %v1767_v44, %v2388_v2  ;;  %v1794_v46 = vadd.f32 %v1775_v63, %v2391_v5  ;;  %v1795_v30 = vadd.f32 %v1779_v62, %v2437_v33  ;;  %v1797_v31 = vadd.f32 %v1787_v36, %v2380_v57 }
 0x2b6   :  { %v1798_v11 = vsel %vm438_vm1, %v1793_v16, -inf  ;;  %v1848_v63 = vmul.f32 %v1847_v61, %v3015_v27 }
 0x2b7   :  { %v1796_v35 = vadd.f32 %v1783_v12, %v2419_v23  ;;  %v1802_v28 = vsel %vm438_vm1, %v1797_v31, -inf  ;;  %v1799_v39 = vsel %vm438_vm1, %v1794_v46, -inf  ;;  %v1800_v51 = vsel %vm438_vm1, %v1795_v30, -inf }
 0x2b8   :  { %v1803_v13 = vmax.f32 %v1798_v11, %v1802_v28 }
 0x2b9   :  { %v1801_v59 = vsel %vm438_vm1, %v1796_v35, -inf }
 0x2ba   :  { %v1804_v40 = vmax.f32 %v1803_v13, %v1799_v39  ;;  %v1805_v9 = vmax.f32 %v1800_v51, %v1801_v59 }
 0x2bc   :  { %v1806_v32 = vmax.f32 %v1804_v40, %v1805_v9 }
 0x2be   :  { %v1807_v60 = vsub.f32 %v1793_v16, %v1806_v32  ;;  %v1808_v7 = vsub.f32 %v1794_v46, %v1806_v32  ;;  %v1809_v53 = vsub.f32 %v1795_v30, %v1806_v32  ;;  %v1810_v25 = vsub.f32 %v1796_v35, %v1806_v32 }
 0x2bf   :  { %v1811_v34 = vsub.f32 %v1797_v31, %v1806_v32 }
 0x2c0   :  { %v1812_v8 = vmul.f32 1.442695, %v1807_v60  ;;  %v1814_v56 = vmul.f32 1.442695, %v1808_v7  ;;  %v1816_v18 = vmul.f32 1.442695, %v1809_v53 }
 0x2c1   :  { %v1818_v45 = vmul.f32 1.442695, %v1810_v25  ;;  %v1820_v10 = vmul.f32 1.442695, %v1811_v34  ;;  %v2203_v34 = vld [vmem:[%s3129_s7] sm:$0xff] }
 0x2c2   :  { %2175 = vpow2.f32 %v1812_v8 }
 0x2c3   :  { %2177 = vpow2.f32 %v1814_v56 }
 0x2c4   :  { %2179 = vpow2.f32 %v1816_v18 }
 0x2c5   :  { %2181 = vpow2.f32 %v1818_v45 }
 0x2c6   :  { %2183 = vpow2.f32 %v1820_v10 }
 0x2cc   :  { %v2176_v55 = vpop.eup %2175 }
 0x2cd   :  { %v2178_v20 = vpop.eup %2177  ;;  %v1822_v49 = vsel %vm438_vm1, %v2176_v55, 0.0 }
 0x2ce   :  { %v2180_v0 = vpop.eup %2179  ;;  %v1823_v41 = vsel %vm438_vm1, %v2178_v20, 0.0 }
 0x2cf   :  { %v2182_v4 = vpop.eup %2181  ;;  %v1824_v26 = vadd.f32 %v1823_v41, %v1822_v49  ;;  %v1825_v21 = vsel %vm438_vm1, %v2180_v0, 0.0 }
 0x2d0   :  { %v2184_v22 = vpop.eup %2183  ;;  %v1827_v38 = vsel %vm438_vm1, %v2182_v4, 0.0 }
 0x2d1   :  { %v1826_v1 = vadd.f32 %v1825_v21, %v1824_v26  ;;  %v1829_v6 = vsel %vm438_vm1, %v2184_v22, 0.0 }
 0x2d3   :  { %v1828_v50 = vadd.f32 %v1827_v38, %v1826_v1 }
 0x2d5   :  { %v1830_v3 = vadd.f32 %v1829_v6, %v1828_v50 }
 0x2d7   :  { %2185 = vlog2.f32 %v1830_v3 }
 0x2e1   :  { %v2186_v52 = vpop.eup %2185 }
 0x2e2   :  { %v1832_v24 = vmul.f32 0.6931472, %v2186_v52 }
 0x2e4   :  { %v1833_v43 = vadd.f32 %v1832_v24, %v1806_v32 }
 0x2e6   :  { %v1836_v42 = vadd.f32 %v1835_v37, %v1833_v43 }
 0x2e8   :  { %v1842_v44 = vmul.f32 %v1841_v15, %v1836_v42 }
 0x2ea   :  { %v3051_v62 = vadd.f32 %v1848_v63, %v1842_v44 }
 0x2ec   :  { %v1851_v36 = vcombine.high %v3051_v62, %v3051_v62  ;;  %v1858_v16 = vrot.slane %v3051_v62, %v2366_v48 }
 0x2ee   :  { %v1865_v12 = vrot.slane %v1851_v36, %v2366_v48  ;;  %v1866_v46 = vcombine.high %v1858_v16, %v1858_v16  ;;  %v1873_v30 = vrot.slane %v1858_v16, %v2366_v48 }
 0x2f0   :  { %v1880_v31 = vrot.slane %v1865_v12, %v2366_v48  ;;  %v1887_v35 = vrot.slane %v1866_v46, %v2366_v48  ;;  %v1888_v11 = vcombine.high %v1873_v30, %v1873_v30  ;;  %v1893_v27 = vrot.slane %v1873_v30, %v2388_v2 }
 0x2f2   :  { %v1889_v28 = vcombine.high %v1887_v35, %v1887_v35  ;;  %v1897_v13 = vrot.slane %v1887_v35, %v2388_v2  ;;  %v1901_v39 = vrot.slane %v1888_v11, %v2388_v2  ;;  %v1909_v51 = vrot.slane %v1880_v31, %v2388_v2  ;;  %v1959_v31 = vld [vmem:[%s3129_s7 + $0x7] sm:$0x1]  ;;  %s2232_s7 = smov [#allocation3]  }
 0x2f3   :  { %v1915_v59 = vadd.f32 %v1893_v27, %v2406_v14  ;;  %v1048_v14 = vsel %vm674_vm8, %v2203_v34, 0.0  ;;  %v1965_v35 = vsub.f32 1.0, %v1959_v31 }
 0x2f4   :  { %v1905_v40 = vrot.slane %v1889_v28, %v2388_v2  ;;  %v1916_v9 = vadd.f32 %v1897_v13, %v2391_v5  ;;  %v1917_v32 = vadd.f32 %v1901_v39, %v2437_v33  ;;  %v1919_v48 = vadd.f32 %v1909_v51, %v2380_v57  ;;  %v2204_v28 = vld [vmem:[%s3130_s8] sm:$0xff]  ;;  %v1957_v39 = vld [vmem:[#allocation2 + $0x38] sm:$0x1f]  ;;  %s2006_s8 = sshll.u32 %s2232_s7, 4  ;;  %s2007_s8 = int_to_ptr.vmem [resolvable:$true] %s2006_s8 }
 0x2f5   :  { %v1920_v7 = vsel %vm438_vm1, %v1915_v59, -inf  ;;  %s2205_s24 = scalar_lea.vmem %s2007_s8, 16  ;;  %s2209_s25 = scalar_lea.vmem %s2007_s8, 32 }
 0x2f6   :  { %v1918_v60 = vadd.f32 %v1905_v40, %v2419_v23  ;;  %v1924_v53 = vsel %vm438_vm1, %v1919_v48, -inf  ;;  %v1921_v8 = vsel %vm438_vm1, %v1916_v9, -inf  ;;  %v1922_v5 = vsel %vm438_vm1, %v1917_v32, -inf  ;;  %p2206_p0 = scmp.ne.s32.totalorder %s2007_s8, %s2205_s24  ;;  %p2210_p1 = scmp.lt.s32.totalorder %s2007_s8, %s2007_s8 }
 0x2f7   :  { %v1925_v25 = vmax.f32 %v1920_v7, %v1924_v53  ;;  %v1049_v23 = vrot.slane %v1048_v14, 4  ;;  %v1969_v40 = vrot.slane %v1965_v35, %v2388_v2  ;;  %p2211_p2 = scmp.lt.s32.totalorder %s2209_s25, %s2205_s24 }
 0x2f8   :  { %v1923_v33 = vsel %vm438_vm1, %v1918_v60, -inf }
 0x2f9   :  { %v1926_v57 = vmax.f32 %v1925_v25, %v1921_v8  ;;  %v1927_v56 = vmax.f32 %v1922_v5, %v1923_v33  ;;  %v1050_v0 = vadd.f32 %v1049_v23, %v1048_v14  ;;  %p2212_p3 = por %p2211_p2, %p2210_p1 }
 0x2fb   :  { %v1928_v18 = vmax.f32 %v1926_v57, %v1927_v56  ;;  %v1051_v1 = vrot.slane %v1050_v0, 2  ;;  %p2213_p4 = pnand %p2212_p3, %p2206_p0 }
 0x2fd   :  { %v1929_v45 = vsub.f32 %v1915_v59, %v1928_v18  ;;  %v1930_v10 = vsub.f32 %v1916_v9, %v1928_v18  ;;  %v1931_v55 = vsub.f32 %v1917_v32, %v1928_v18  ;;  %v1932_v20 = vsub.f32 %v1918_v60, %v1928_v18 }
 0x2fe   :  { %v1933_v49 = vsub.f32 %v1919_v48, %v1928_v18  ;;  %v1052_v38 = vadd.f32 %v1051_v1, %v1050_v0  ;;  %v1963_v59 = vrot.slane %v1959_v31, %v2388_v2  ;;  %v1970_v60 = vmul.f32 %v1969_v40, %v3051_v62 }
 0x2ff   :  { %v1934_v41 = vmul.f32 1.442695, %v1929_v45  ;;  %v1936_v4 = vmul.f32 1.442695, %v1930_v10  ;;  %v1938_v26 = vmul.f32 1.442695, %v1931_v55 }
 0x300   :  { %v1940_v21 = vmul.f32 1.442695, %v1932_v20  ;;  %v1942_v22 = vmul.f32 1.442695, %v1933_v49  ;;  %v1053_v6 = vrot.slane %v1052_v38, 1 }
 0x301   :  { %2187 = vpow2.f32 %v1934_v41 }
 0x302   :  { %2189 = vpow2.f32 %v1936_v4  ;;  %v3082_v43 = vadd.f32 %v1053_v6, %v1052_v38 }
 0x303   :  { %2191 = vpow2.f32 %v1938_v26 }
 0x304   :  { %2193 = vpow2.f32 %v1940_v21  ;;  %v2107_v36 = vtrunc.f32 %v3082_v43 }
 0x305   :  { %2195 = vpow2.f32 %v1942_v22 }
 0x306   :  { %v2108_v46 = vcvt.f32.s32 %v2107_v36 }
 0x308   :  { %v2060_v30 = vadd.s32 4294967295, %v2108_v46 }
 0x30a   :  { %vm1057_vm11 = vcmp.eq.s32.totalorder %v2363_v47, %v2060_v30 }
 0x30b   :  { %v2188_v50 = vpop.eup %2187  ;;  %v1058_v13 = vsel %vm1057_vm11, %v2204_v28, 0 }
 0x30c   :  { %v2190_v3 = vpop.eup %2189  ;;  %v1944_v54 = vsel %vm438_vm1, %v2188_v50, 0.0  ;;  %v1059_v9 = vsel %vm674_vm8, %v1058_v13, 0 }
 0x30d   :  { %v2192_v19 = vpop.eup %2191  ;;  %v1945_v52 = vsel %vm438_vm1, %v2190_v3, 0.0  ;;  %v1060_v7 = vrot.slane %v1059_v9, 4 }
 0x30e   :  { %v2194_v24 = vpop.eup %2193  ;;  %v1946_v37 = vadd.f32 %v1945_v52, %v1944_v54  ;;  %v1947_v15 = vsel %vm438_vm1, %v2192_v19, 0.0 }
 0x30f   :  { %v2196_v61 = vpop.eup %2195  ;;  %v1949_v44 = vsel %vm438_vm1, %v2194_v24, 0.0  ;;  %v1061_v34 = vadd.s32 %v1060_v7, %v1059_v9 }
 0x310   :  { %v1948_v42 = vadd.f32 %v1947_v15, %v1946_v37  ;;  %v1951_v16 = vsel %vm438_vm1, %v2196_v61, 0.0 }
 0x311   :  { %v1062_v5 = vrot.slane %v1061_v34, 2 }
 0x312   :  { %v1950_v63 = vadd.f32 %v1949_v44, %v1948_v42 }
 0x313   :  { %v1063_v56 = vadd.s32 %v1062_v5, %v1061_v34 }
 0x314   :  { %v1952_v12 = vadd.f32 %v1951_v16, %v1950_v63 }
 0x316   :  { %2197 = vlog2.f32 %v1952_v12 }
 0x320   :  { %v2198_v11 = vpop.eup %2197 }
 0x321   :  { %v1954_v27 = vmul.f32 0.6931472, %v2198_v11 }
 0x323   :  { %v1955_v51 = vadd.f32 %v1954_v27, %v1928_v18  ;;  %v1064_v18 = vrot.slane %v1063_v56, 1 }
 0x325   :  { %v1958_v32 = vadd.f32 %v1957_v39, %v1955_v51  ;;  %v1065_v55 = vadd.s32 %v1064_v18, %v1063_v56 }
 0x327   :  { %v1964_v48 = vmul.f32 %v1963_v59, %v1958_v32  ;;  %vm1066_vm15 = vcmp.eq.s32.totalorder %v2363_v47, %v1065_v55 }
 0x328   :  { %v2061_v62 = vsel %vm1066_vm15, 1.0, %v2231_v29 }
 0x329   :  { %v1971_v53 = vadd.f32 %v1970_v60, %v1964_v48  ;;  %v1075_v49 = vmul.f32 %v2061_v62, %v2649_v17 }
 0x32b   :  { %v1972_v25 = vadd.f32 %v1971_v53, %v2649_v17  ;;  %v1076_v4 = vsel %vm438_vm1, %v1075_v49, 0.0 }
 0x32c   :  { %v1077_v22 = vrot.slane %v1076_v4, 4 }
 0x32d   :  { %v1973_v14 = vsel %vm438_vm1, %v1972_v25, -inf }
 0x32e   :  { %v1974_v8 = vrot.slane %v1973_v14, 4  ;;  %v1078_v50 = vadd.f32 %v1077_v22, %v1076_v4 }
 0x330   :  { %v1975_v33 = vmax.f32 %v1973_v14, %v1974_v8  ;;  %v1079_v54 = vrot.slane %v1078_v50, 2 }
 0x332   :  { %v1976_v57 = vrot.slane %v1975_v33, 2  ;;  %v1080_v47 = vadd.f32 %v1079_v54, %v1078_v50 }
 0x334   :  { %v1977_v23 = vmax.f32 %v1975_v33, %v1976_v57  ;;  %v1081_v19 = vrot.slane %v1080_v47, 1 }
 0x336   :  { %v1978_v2 = vrot.slane %v1977_v23, 1  ;;  %v1082_v24 = vadd.f32 %v1081_v19, %v1080_v47 }
 0x338   :  { %v1979_v45 = vmax.f32 %v1977_v23, %v1978_v2  ;;  %v1085_v37 = vadd.f32 %v2901_v58, %v1082_v24 }
 0x33a   :  { %v1980_v10 = vsub.f32 %v1972_v25, %v1979_v45 }
 0x33c   :  { %v1981_v20 = vmul.f32 1.442695, %v1980_v10 }
 0x33e   :  { %2199 = vpow2.f32 %v1981_v20 }
 0x348   :  { %v2200_v0 = vpop.eup %2199 }
 0x349   :  { %v1983_v41 = vsel %vm438_vm1, %v2200_v0, 0.0  ;;  %vm1993_vm1 = vcmp.gt.f32.partialorder %v3082_v43, 0.0 }
 0x34a   :  { %v1984_v26 = vrot.slane %v1983_v41, 4  ;;  %v2062_v42 = vsel %vm1993_vm1, 1.0, %v2231_v29 }
 0x34c   :  { %v1985_v21 = vadd.f32 %v1984_v26, %v1983_v41 }
 0x34e   :  { %v1986_v1 = vrot.slane %v1985_v21, 2 }
 0x350   :  { %v1987_v38 = vadd.f32 %v1986_v1, %v1985_v21 }
 0x352   :  { %v1988_v6 = vrot.slane %v1987_v38, 1 }
 0x354   :  { %v1989_v3 = vadd.f32 %v1988_v6, %v1987_v38 }
 0x356   :  { %2201 = vlog2.f32 %v1989_v3 }
 0x360   :  { %v2202_v52 = vpop.eup %2201 }
 0x361   :  { %v1991_v17 = vmul.f32 0.6931472, %v2202_v52 }
 0x363   :  { %v1992_v15 = vadd.f32 %v1991_v17, %v1979_v45 }
 0x365   :  { %v1996_v61 = vsub.f32 %v1085_v37, %v1992_v15 }
 0x367   :  { %v1997_v44 = vsub.f32 0.0, %v1996_v61 }
 0x369   :  { %v1998_v63 = vmul.f32 %v2062_v42, %v1997_v44 }
 0x36b   :  { %1999 = vst.msk [vmem:[#allocation3] sm:$0x1] %vm905_vm6, %v1998_v63 }
 0x36c   :  { %2216 = shalt.err (!%p2213_p4)
}
 0x36d   :  { %s2217_s28 = scalar_lea.hbm %s3131_s9, 16 }
 0x36e   :  { %p2218_p5 = scmp.ne.s32.totalorder %s3131_s9, %s2217_s28  ;;  %p2221_p6 = scmp.lt.u32.totalorder %s2217_s28, %s3131_s9 }
 0x370   :  { %p2223_p7 = pnand %p2221_p6, %p2218_p5 }
 0x372   :  { %2226 = shalt.err (!%p2223_p7)
}
 0x373   :  { %2009 = dma.vmem_to_hbm [thread:$0]  %s2007_s8, 16, %s3131_s9, [#allocation4]  }
 0x374   :  { %2227 = dma.done.wait [#allocation4], 16  }
 0x375   :  { %2228 = vsyncadd [#allocation4], 4294967280 }
 0x376   :  { %2013 = vsyncpa [#allocation4], 1 }

</bundles_post_ra>
